<compile_context>
chip_gen: v7x
topology: tpu7x:2x2x1
jax: 0.10.0
libtpu: 0.0.40
codegen_flags: <defaults>
</compile_context>

<pallas_src>
import functools
import math

import jax
import jax.numpy as jnp
from jax.experimental import pallas as pl
from jax.experimental.pallas import tpu as pltpu

N_HEADS = 2
_NEG_INF = -1e9


# ----------------------------------------------------------------------------
# Tiling helpers
# ----------------------------------------------------------------------------
def _round_up(x, m):
    return ((x + m - 1) // m) * m


def _vmem_limit():
    """Per-generation scoped-VMEM ceiling (v7x has only 64 MiB physical/TC)."""
    try:
        kind = jax.devices()[0].device_kind.lower()
    except Exception:
        kind = ""
    return (48 << 20) if "v7" in kind else (96 << 20)


def _row_tile(M):
    """Row (sublane) tile: 512/256 when possible, otherwise an 8-aligned full M."""
    if M >= 512:
        return 512
    if M >= 256:
        return 256
    return _round_up(M, 8)


def _pad_rows(x, bm):
    """Pad rows up to a multiple of bm (instead of falling back to a full-M block)."""
    M = x.shape[0]
    Mp = _round_up(M, bm)
    if Mp != M:
        x = jnp.pad(x, ((0, Mp - M), (0, 0)))
    return x, M


# ----------------------------------------------------------------------------
# Pallas kernels
# ----------------------------------------------------------------------------
def _linear_kernel(x_ref, w_ref, b_ref, o_ref, *, act):
    """o = act(x @ w + b); bf16 matmul inputs, f32 accumulate + epilogue."""
    y = jnp.dot(x_ref[...], w_ref[...], preferred_element_type=jnp.float32)
    y = y + b_ref[...]
    if act == "relu":
        y = jnp.maximum(y, 0.0)
    elif act == "gelu":
        y = jax.nn.gelu(y)  # tanh approximation (see TODO at top of file)
    o_ref[...] = y.astype(o_ref.dtype)


def linear(x, w, b, act="none", out_dtype=jnp.bfloat16):
    M, K = x.shape
    N = w.shape[1]
    bm = _row_tile(M)
    xp, M0 = _pad_rows(x, bm)
    Mp = xp.shape[0]
    bn = 256 if (N % 256 == 0) else N
    out = pl.pallas_call(
        functools.partial(_linear_kernel, act=act),
        out_shape=jax.ShapeDtypeStruct((Mp, N), out_dtype),
        grid=(Mp // bm, N // bn),
        in_specs=[
            pl.BlockSpec((bm, K), lambda i, j: (i, 0)),
            pl.BlockSpec((K, bn), lambda i, j: (0, j)),
            pl.BlockSpec((1, bn), lambda i, j: (0, j)),
        ],
        out_specs=pl.BlockSpec((bm, bn), lambda i, j: (i, j)),
        compiler_params=pltpu.CompilerParams(
            dimension_semantics=("parallel", "parallel"),
            vmem_limit_bytes=_vmem_limit()),
    )(xp, w, b.reshape(1, N))
    return out[:M0] if Mp != M0 else out


def _linear_res_ln_kernel(x_ref, w_ref, b_ref, r_ref, g_ref, bb_ref, o_ref,
                          acc_ref, *, eps):
    """o = LayerNorm(x @ w + b + residual); K-tiled matmul, f32 accumulator."""
    k = pl.program_id(1)

    @pl.when(k == 0)
    def _():
        acc_ref[...] = jnp.zeros_like(acc_ref)

    acc_ref[...] += jnp.dot(x_ref[...], w_ref[...],
                            preferred_element_type=jnp.float32)

    @pl.when(k == pl.num_programs(1) - 1)
    def _():
        y = acc_ref[...] + b_ref[...] + r_ref[...].astype(jnp.float32)
        mu = jnp.mean(y, axis=-1, keepdims=True)
        var = jnp.mean((y - mu) ** 2, axis=-1, keepdims=True)
        y = (y - mu) * jax.lax.rsqrt(var + eps)
        o_ref[...] = (y * g_ref[...] + bb_ref[...]).astype(o_ref.dtype)


def linear_res_ln(x, w, b, residual, g, beta, eps=1e-5, out_dtype=jnp.bfloat16):
    M, K = x.shape
    N = w.shape[1]
    bm = _row_tile(M)
    if K % 512 == 0 and K > 512:
        bk = 512
    elif K % 256 == 0 and K > 256:
        bk = 256
    else:
        bk = K
    xp, M0 = _pad_rows(x, bm)
    rp, _ = _pad_rows(residual, bm)
    Mp = xp.shape[0]
    out = pl.pallas_call(
        functools.partial(_linear_res_ln_kernel, eps=eps),
        out_shape=jax.ShapeDtypeStruct((Mp, N), out_dtype),
        grid=(Mp // bm, K // bk),
        in_specs=[
            pl.BlockSpec((bm, bk), lambda i, k: (i, k)),
            pl.BlockSpec((bk, N), lambda i, k: (k, 0)),
            pl.BlockSpec((1, N), lambda i, k: (0, 0)),
            pl.BlockSpec((bm, N), lambda i, k: (i, 0)),
            pl.BlockSpec((1, N), lambda i, k: (0, 0)),
            pl.BlockSpec((1, N), lambda i, k: (0, 0)),
        ],
        out_specs=pl.BlockSpec((bm, N), lambda i, k: (i, 0)),
        scratch_shapes=[pltpu.VMEM((bm, N), jnp.float32)],
        compiler_params=pltpu.CompilerParams(
            dimension_semantics=("parallel", "arbitrary"),
            vmem_limit_bytes=_vmem_limit()),
    )(xp, w, b.reshape(1, N), rp, g, beta)
    return out[:M0] if Mp != M0 else out


def _layernorm_kernel(x_ref, g_ref, b_ref, o_ref, *, eps):
    x = x_ref[...].astype(jnp.float32)
    mu = jnp.mean(x, axis=-1, keepdims=True)
    var = jnp.mean((x - mu) ** 2, axis=-1, keepdims=True)
    y = (x - mu) * jax.lax.rsqrt(var + eps)
    o_ref[...] = (y * g_ref[...] + b_ref[...]).astype(o_ref.dtype)


def layernorm(x, g, b, eps=1e-5, out_dtype=jnp.bfloat16):
    M, H = x.shape
    bm = _row_tile(M)
    xp, M0 = _pad_rows(x, bm)
    Mp = xp.shape[0]
    out = pl.pallas_call(
        functools.partial(_layernorm_kernel, eps=eps),
        out_shape=jax.ShapeDtypeStruct((Mp, H), out_dtype),
        grid=(Mp // bm,),
        in_specs=[
            pl.BlockSpec((bm, H), lambda i: (i, 0)),
            pl.BlockSpec((1, H), lambda i: (0, 0)),
            pl.BlockSpec((1, H), lambda i: (0, 0)),
        ],
        out_specs=pl.BlockSpec((bm, H), lambda i: (i, 0)),
        compiler_params=pltpu.CompilerParams(
            dimension_semantics=("parallel",),
            vmem_limit_bytes=_vmem_limit()),
    )(xp, g, b)
    return out[:M0] if Mp != M0 else out


def _attn_kernel(x_ref, wqkv_ref, bqkv_ref, m_ref, o_ref, acc_ref, *, n_heads):
    """Fused QKV projection + multi-head attention for one batch element.

    bf16 matmuls with f32 accumulation; softmax scale pre-baked into wqkv's Q
    columns; per-head PV results land in an (S, H) f32 scratch slab and are
    stored with a single lane-dense store (no transpose / no concatenate).
    """
    x = x_ref[0]                                              # (S, H) bf16
    mask = m_ref[0]                                           # (1, S) f32
    S, H = x.shape
    dh = H // n_heads

    qkv = jnp.dot(x, wqkv_ref[...], preferred_element_type=jnp.float32)
    qkv = (qkv + bqkv_ref[...]).astype(jnp.bfloat16)          # (S, 3H)
    q = qkv[:, :H]
    k = qkv[:, H:2 * H]
    v = qkv[:, 2 * H:]

    for h in range(n_heads):                                  # static unrolled
        qh = q[:, h * dh:(h + 1) * dh]
        kh = k[:, h * dh:(h + 1) * dh]
        vh = v[:, h * dh:(h + 1) * dh]
        # scores: contract last dims directly (no materialized kh.T)
        s = jax.lax.dot_general(qh, kh, (((1,), (1,)), ((), ())),
                                preferred_element_type=jnp.float32)   # (S, S)
        s = jnp.where(mask > 0.0, s, _NEG_INF)
        s = s - jnp.max(s, axis=-1, keepdims=True)
        p = jnp.exp(s)
        p = p * pl.reciprocal(jnp.sum(p, axis=-1, keepdims=True), approx=True)
        acc_ref[:, h * dh:(h + 1) * dh] = jnp.dot(
            p.astype(jnp.bfloat16), vh, preferred_element_type=jnp.float32)

    o_ref[0] = acc_ref[...].astype(o_ref.dtype)               # one lane-dense store


def attention(x, wqkv, bqkv, mask, n_heads):
    """x: (B, S, H) bf16; wqkv: (H, 3H) bf16; mask: (B, S) f32 -> (B, S, H) bf16."""
    B, S, H = x.shape
    threeH = 3 * H
    mask3 = mask.reshape(B, 1, S)
    return pl.pallas_call(
        functools.partial(_attn_kernel, n_heads=n_heads),
        out_shape=jax.ShapeDtypeStruct((B, S, H), jnp.bfloat16),
        grid=(B,),
        in_specs=[
            pl.BlockSpec((1, S, H), lambda b: (b, 0, 0)),
            pl.BlockSpec((H, threeH), lambda b: (0, 0)),   # constant block: fetched once
            pl.BlockSpec((1, threeH), lambda b: (0, 0)),
            pl.BlockSpec((1, 1, S), lambda b: (b, 0, 0)),
        ],
        out_specs=pl.BlockSpec((1, S, H), lambda b: (b, 0, 0)),
        scratch_shapes=[pltpu.VMEM((S, H), jnp.float32)],
        compiler_params=pltpu.CompilerParams(
            dimension_semantics=("parallel",),
            vmem_limit_bytes=_vmem_limit()),
    )(x, wqkv, bqkv.reshape(1, threeH), mask3)


def _head_kernel(x_ref, w1_ref, b1_ref, w2_ref, b2_ref, o_ref):
    """Fused classifier head: relu(x @ w1 + b1) @ w2 + b2 (w2/b2 lane-padded)."""
    h = jnp.dot(x_ref[...], w1_ref[...], preferred_element_type=jnp.float32)
    h = jnp.maximum(h + b1_ref[...], 0.0)
    y = jnp.dot(h.astype(jnp.bfloat16), w2_ref[...],
                preferred_element_type=jnp.float32) + b2_ref[...]
    o_ref[...] = y.astype(o_ref.dtype)


def classifier_head(x, w1, b1, w2p, b2p):
    B, K = x.shape
    N1 = w1.shape[1]
    Np = w2p.shape[1]
    return pl.pallas_call(
        _head_kernel,
        out_shape=jax.ShapeDtypeStruct((B, Np), jnp.float32),
        in_specs=[
            pl.BlockSpec((B, K), lambda: (0, 0)),
            pl.BlockSpec((K, N1), lambda: (0, 0)),
            pl.BlockSpec((1, N1), lambda: (0, 0)),
            pl.BlockSpec((N1, Np), lambda: (0, 0)),
            pl.BlockSpec((1, Np), lambda: (0, 0)),
        ],
        out_specs=pl.BlockSpec((B, Np), lambda: (0, 0)),
        compiler_params=pltpu.CompilerParams(vmem_limit_bytes=_vmem_limit()),
    )(x, w1, b1.reshape(1, N1), w2p, b2p.reshape(1, Np))


# ----------------------------------------------------------------------------
# Encoder / classifier glue (reshapes + parameter plumbing in plain JAX)
# ----------------------------------------------------------------------------
def encoder_layer(x, mask, lp):
    B, S, H = x.shape
    x2 = x.reshape(B * S, H)

    # fused QKV projection + MHA, stays in (B, S, H) layout, bf16
    ctx = attention(x, lp["wqkv"], lp["bqkv"], mask, N_HEADS)
    ctx2 = ctx.reshape(B * S, H)

    # attn output projection + residual + LayerNorm, fused
    h = linear_res_ln(ctx2, lp["wo"], lp["bo"], x2, lp["ln1_g"], lp["ln1_b"])
    # FFN up-projection + GELU
    ff = linear(h, lp["w1"], lp["b1"], act="gelu")
    # FFN down-projection + residual + LayerNorm, fused (K-tiled)
    out = linear_res_ln(ff, lp["w2"], lp["b2"], h, lp["ln2_g"], lp["ln2_b"])
    return out.reshape(B, S, H)


def encode(params, ids, mask):
    B, S = ids.shape
    H = params["word_emb"].shape[1]
    we = params["word_emb"][ids]                       # gather (glue, XLA)
    pe = params["pos_emb"][jnp.arange(S)][None, :, :]
    x = (we + pe).reshape(B * S, H)
    x = layernorm(x, params["emb_ln_g"], params["emb_ln_b"],
                  out_dtype=jnp.bfloat16).reshape(B, S, H)
    for lp in params["layers"]:
        x = encoder_layer(x, mask, lp)
    return x[:, 0, :]                                  # CLS token, (B, H) bf16


def siamese_forward(params, ids1, mask1, ids2, mask2):
    B = ids1.shape[0]
    # Batch the two towers: a single 2B encode pass halves launches, doubles M.
    ids = jnp.concatenate([ids1, ids2], axis=0)
    mask = jnp.concatenate([mask1, mask2], axis=0)
    reps = encode(params, ids, mask)                   # (2B, H) bf16
    rep1, rep2 = reps[:B], reps[B:]
    combined = jnp.concatenate([rep1, rep2], axis=1)   # (B, 2H) bf16
    # dropout(combined) / dropout(h) -> identity at inference
    out = classifier_head(combined, params["cls_w1"], params["cls_b1"],
                          params["cls_w2p"], params["cls_b2p"])  # (B, 128) f32
    return out[:, 0]                                   # (B,)


# ----------------------------------------------------------------------------
# Deterministic parameter init (matmul weights stored bf16)
# ----------------------------------------------------------------------------
def init_params(key, *, vocab, H, n_layers, ffn, max_pos):
    ks = jax.random.split(key, 4 + n_layers)

    def dense(k, shape):
        return jax.random.normal(k, shape, jnp.float32) * 0.02

    params = {
        "word_emb": dense(ks[0], (vocab, H)),
        "pos_emb": dense(ks[1], (max_pos, H)),
        "emb_ln_g": jnp.ones((1, H), jnp.float32),
        "emb_ln_b": jnp.zeros((1, H), jnp.float32),
        "layers": [],
    }
    scale = 1.0 / math.sqrt(H // N_HEADS)
    for i in range(n_layers):
        lk = jax.random.split(ks[4 + i], 6)
        wq, wk, wv = dense(lk[0], (H, H)), dense(lk[1], (H, H)), dense(lk[2], (H, H))
        # softmax 1/sqrt(dh) scale baked into the Q columns of the fused QKV weight
        wqkv = jnp.concatenate([wq * scale, wk, wv], axis=1)
        params["layers"].append({
            "wqkv": wqkv.astype(jnp.bfloat16),                  # (H, 3H) fused
            "bqkv": jnp.zeros((3 * H,), jnp.float32),
            "wo": dense(lk[3], (H, H)).astype(jnp.bfloat16),
            "bo": jnp.zeros((H,), jnp.float32),
            "ln1_g": jnp.ones((1, H), jnp.float32), "ln1_b": jnp.zeros((1, H), jnp.float32),
            "w1": dense(lk[4], (H, ffn)).astype(jnp.bfloat16),
            "b1": jnp.zeros((ffn,), jnp.float32),
            "w2": dense(lk[5], (ffn, H)).astype(jnp.bfloat16),
            "b2": jnp.zeros((H,), jnp.float32),
            "ln2_g": jnp.ones((1, H), jnp.float32), "ln2_b": jnp.zeros((1, H), jnp.float32),
        })
    ck = jax.random.split(ks[2], 2)
    params["cls_w1"] = dense(ck[0], (2 * H, 256)).astype(jnp.bfloat16)
    params["cls_b1"] = jnp.zeros((256,), jnp.float32)
    # Final (256, 1) projection lane-padded to 128 columns (col 0 is the real one)
    w2 = dense(ck[1], (256, 1))
    params["cls_w2p"] = jnp.pad(w2, ((0, 0), (0, 127))).astype(jnp.bfloat16)
    params["cls_b2p"] = jnp.zeros((128,), jnp.float32)
    return params


# ----------------------------------------------------------------------------
if __name__ == "__main__":
    B, S, H, LAYERS, FFN, VOCAB = 2, 8, 32, 2, 64, 64

    key = jax.random.PRNGKey(0)
    kp, k1, k2 = jax.random.split(key, 3)

    params = init_params(kp, vocab=VOCAB, H=H, n_layers=LAYERS, ffn=FFN, max_pos=S)

    input_ids_1 = jax.random.randint(k1, (B, S), 0, VOCAB, dtype=jnp.int32)
    input_ids_2 = jax.random.randint(k2, (B, S), 0, VOCAB, dtype=jnp.int32)
    # second sequence of each pair has its last two tokens padded out
    attention_mask_1 = jnp.ones((B, S), jnp.float32)
    attention_mask_2 = jnp.concatenate(
        [jnp.ones((B, S - 2), jnp.float32), jnp.zeros((B, 2), jnp.float32)], axis=1)

    fwd = jax.jit(siamese_forward)
    out = fwd(params, input_ids_1, attention_mask_1, input_ids_2, attention_mask_2)
    out = jax.block_until_ready(out)

    assert out.shape == (B,) and out.dtype == jnp.float32
    print("KERNEL_OK")
</pallas_src>

<mosaic_0001>
module attributes {stable_mosaic.version = 11 : i64} {
  func.func @_layernorm_kernel(%arg0: i32, %arg1: memref<32x32xf32, #tpu.memory_space<vmem>>, %arg2: memref<1x32xf32, #tpu.memory_space<vmem>>, %arg3: memref<1x32xf32, #tpu.memory_space<vmem>>, %arg4: memref<32x32xbf16, #tpu.memory_space<vmem>>) attributes {dimension_semantics = [#tpu.dimension_semantics<parallel>], iteration_bounds = array<i64: 1>, scalar_prefetch = 0 : i64, scratch_operands = 0 : i64, tpu.core_type = #tpu.core_type<tc>, window_params = [{transform_indices = @transform_0, window_bounds = array<i64: 32, 32>}, {pipeline_mode = #tpu.pipeline_mode<synchronous>, transform_indices = @transform_1, window_bounds = array<i64: 1, 32>}, {pipeline_mode = #tpu.pipeline_mode<synchronous>, transform_indices = @transform_2, window_bounds = array<i64: 1, 32>}, {transform_indices = @transform_3, window_bounds = array<i64: 32, 32>}]} {
    %c0 = arith.constant 0 : index
    %c0_0 = arith.constant 0 : index
    %0 = vector.load %arg1[%c0, %c0_0] : memref<32x32xf32, #tpu.memory_space<vmem>>, vector<32x32xf32>
    %cst = arith.constant dense<0.000000e+00> : vector<32xf32>
    %1 = vector.multi_reduction <add>, %0, %cst [1] : vector<32x32xf32> to vector<32xf32>
    %2 = vector.shape_cast %1 : vector<32xf32> to vector<32x1xf32>
    %cst_1 = arith.constant 3.200000e+01 : f32
    %3 = vector.broadcast %cst_1 : f32 to vector<32x1xf32>
    %4 = arith.divf %2, %3 : vector<32x1xf32>
    %5 = vector.broadcast %4 : vector<32x1xf32> to vector<32x32xf32>
    %6 = arith.subf %0, %5 : vector<32x32xf32>
    %7 = arith.mulf %6, %6 : vector<32x32xf32>
    %cst_2 = arith.constant dense<0.000000e+00> : vector<32xf32>
    %8 = vector.multi_reduction <add>, %7, %cst_2 [1] : vector<32x32xf32> to vector<32xf32>
    %9 = vector.shape_cast %8 : vector<32xf32> to vector<32x1xf32>
    %cst_3 = arith.constant 3.200000e+01 : f32
    %10 = vector.broadcast %cst_3 : f32 to vector<32x1xf32>
    %11 = arith.divf %9, %10 : vector<32x1xf32>
    %12 = vector.broadcast %4 : vector<32x1xf32> to vector<32x32xf32>
    %13 = arith.subf %0, %12 : vector<32x32xf32>
    %cst_4 = arith.constant 9.99999974E-6 : f32
    %14 = vector.broadcast %cst_4 : f32 to vector<32x1xf32>
    %15 = arith.addf %11, %14 : vector<32x1xf32>
    %16 = math.rsqrt %15 : vector<32x1xf32>
    %17 = vector.broadcast %16 : vector<32x1xf32> to vector<32x32xf32>
    %18 = arith.mulf %13, %17 : vector<32x32xf32>
    %c0_5 = arith.constant 0 : index
    %c0_6 = arith.constant 0 : index
    %19 = vector.load %arg2[%c0_5, %c0_6] : memref<1x32xf32, #tpu.memory_space<vmem>>, vector<1x32xf32>
    %20 = vector.broadcast %19 : vector<1x32xf32> to vector<32x32xf32>
    %21 = arith.mulf %18, %20 : vector<32x32xf32>
    %c0_7 = arith.constant 0 : index
    %c0_8 = arith.constant 0 : index
    %22 = vector.load %arg3[%c0_7, %c0_8] : memref<1x32xf32, #tpu.memory_space<vmem>>, vector<1x32xf32>
    %23 = vector.broadcast %22 : vector<1x32xf32> to vector<32x32xf32>
    %24 = arith.addf %21, %23 : vector<32x32xf32>
    %25 = arith.truncf %24 : vector<32x32xf32> to vector<32x32xbf16>
    %c0_9 = arith.constant 0 : index
    %c0_10 = arith.constant 0 : index
    %26 = vector.load %arg4[%c0_9, %c0_10] : memref<32x32xbf16, #tpu.memory_space<vmem>>, vector<32x32xbf16>
    tpu.vector_store %arg4[%c0_9, %c0_10], %25 {strides = array<i32>} : memref<32x32xbf16, #tpu.memory_space<vmem>>, vector<32x32xbf16>,
    return
  }
  func.func @transform_0(%arg0: i32) -> (i32, i32) {
    %c0_i32 = arith.constant 0 : i32
    %c0_i32_0 = arith.constant 0 : i32
    return %arg0, %c0_i32 : i32, i32
  }
  func.func @transform_1(%arg0: i32) -> (i32, i32) {
    %c0_i32 = arith.constant 0 : i32
    %c0_i32_0 = arith.constant 0 : i32
    %c0_i32_1 = arith.constant 0 : i32
    return %c0_i32, %c0_i32_0 : i32, i32
  }
  func.func @transform_2(%arg0: i32) -> (i32, i32) {
    %c0_i32 = arith.constant 0 : i32
    %c0_i32_0 = arith.constant 0 : i32
    %c0_i32_1 = arith.constant 0 : i32
    return %c0_i32, %c0_i32_0 : i32, i32
  }
  func.func @transform_3(%arg0: i32) -> (i32, i32) {
    %c0_i32 = arith.constant 0 : i32
    %c0_i32_0 = arith.constant 0 : i32
    return %arg0, %c0_i32 : i32, i32
  }
}

module attributes {stable_mosaic.version = 11 : i64} {
  func.func @_linear_res_ln_kernel(%arg0: i32, %arg1: i32, %arg2: memref<32x32xbf16, #tpu.memory_space<vmem>>, %arg3: memref<32x32xbf16, #tpu.memory_space<vmem>>, %arg4: memref<1x32xf32, #tpu.memory_space<vmem>>, %arg5: memref<32x32xbf16, #tpu.memory_space<vmem>>, %arg6: memref<1x32xf32, #tpu.memory_space<vmem>>, %arg7: memref<1x32xf32, #tpu.memory_space<vmem>>, %arg8: memref<32x32xbf16, #tpu.memory_space<vmem>>, %arg9: memref<32x32xf32, #tpu.memory_space<vmem>>) attributes {dimension_semantics = [#tpu.dimension_semantics<parallel>, #tpu.dimension_semantics<arbitrary>], iteration_bounds = array<i64: 1, 1>, scalar_prefetch = 0 : i64, scratch_operands = 1 : i64, tpu.core_type = #tpu.core_type<tc>, window_params = [{transform_indices = @transform_0, window_bounds = array<i64: 32, 32>}, {transform_indices = @transform_1, window_bounds = array<i64: 32, 32>}, {pipeline_mode = #tpu.pipeline_mode<synchronous>, transform_indices = @transform_2, window_bounds = array<i64: 1, 32>}, {transform_indices = @transform_3, window_bounds = array<i64: 32, 32>}, {pipeline_mode = #tpu.pipeline_mode<synchronous>, transform_indices = @transform_4, window_bounds = array<i64: 1, 32>}, {pipeline_mode = #tpu.pipeline_mode<synchronous>, transform_indices = @transform_5, window_bounds = array<i64: 1, 32>}, {transform_indices = @transform_6, window_bounds = array<i64: 32, 32>}]} {
    %c0_i32 = arith.constant 0 : i32
    %0 = arith.cmpi eq, %arg1, %c0_i32 : i32
    %1 = arith.extui %0 : i1 to i32
    %c0_i32_0 = arith.constant 0 : i32
    %2 = arith.cmpi ne, %1, %c0_i32_0 : i32
    scf.if %2 {
      %cst_10 = arith.constant 0.000000e+00 : f32
      %12 = vector.broadcast %cst_10 : f32 to vector<32x32xf32>
      %c0_11 = arith.constant 0 : index
      %c0_12 = arith.constant 0 : index
      %13 = vector.load %arg9[%c0_11, %c0_12] : memref<32x32xf32, #tpu.memory_space<vmem>>, vector<32x32xf32>
      tpu.vector_store %arg9[%c0_11, %c0_12], %12 {strides = array<i32>} : memref<32x32xf32, #tpu.memory_space<vmem>>, vector<32x32xf32>,
    } else {
    }
    %c0 = arith.constant 0 : index
    %c0_1 = arith.constant 0 : index
    %3 = vector.load %arg9[%c0, %c0_1] : memref<32x32xf32, #tpu.memory_space<vmem>>, vector<32x32xf32>
    %c0_2 = arith.constant 0 : index
    %c0_3 = arith.constant 0 : index
    %4 = vector.load %arg2[%c0_2, %c0_3] : memref<32x32xbf16, #tpu.memory_space<vmem>>, vector<32x32xbf16>
    %c0_4 = arith.constant 0 : index
    %c0_5 = arith.constant 0 : index
    %5 = vector.load %arg3[%c0_4, %c0_5] : memref<32x32xbf16, #tpu.memory_space<vmem>>, vector<32x32xbf16>
    %cst = arith.constant dense<0.000000e+00> : vector<32x32xf32>
    %6 = tpu.matmul %4, %5, %cst {dimension_numbers = #tpu.dot_dimension_numbers<[1], [0], [0], [1], [0, 0, 1, 1], [], []>} : vector<32x32xbf16>, vector<32x32xbf16>, vector<32x32xf32> -> vector<32x32xf32>
    %7 = arith.addf %3, %6 : vector<32x32xf32>
    %c0_6 = arith.constant 0 : index
    %c0_7 = arith.constant 0 : index
    %8 = vector.load %arg9[%c0_6, %c0_7] : memref<32x32xf32, #tpu.memory_space<vmem>>, vector<32x32xf32>
    tpu.vector_store %arg9[%c0_6, %c0_7], %7 {strides = array<i32>} : memref<32x32xf32, #tpu.memory_space<vmem>>, vector<32x32xf32>,
    %c0_i32_8 = arith.constant 0 : i32
    %9 = arith.cmpi eq, %arg1, %c0_i32_8 : i32
    %10 = arith.extui %9 : i1 to i32
    %c0_i32_9 = arith.constant 0 : i32
    %11 = arith.cmpi ne, %10, %c0_i32_9 : i32
    scf.if %11 {
      %c0_10 = arith.constant 0 : index
      %c0_11 = arith.constant 0 : index
      %12 = vector.load %arg9[%c0_10, %c0_11] : memref<32x32xf32, #tpu.memory_space<vmem>>, vector<32x32xf32>
      %c0_12 = arith.constant 0 : index
      %c0_13 = arith.constant 0 : index
      %13 = vector.load %arg4[%c0_12, %c0_13] : memref<1x32xf32, #tpu.memory_space<vmem>>, vector<1x32xf32>
      %14 = vector.broadcast %13 : vector<1x32xf32> to vector<32x32xf32>
      %15 = arith.addf %12, %14 : vector<32x32xf32>
      %c0_14 = arith.constant 0 : index
      %c0_15 = arith.constant 0 : index
      %16 = vector.load %arg5[%c0_14, %c0_15] : memref<32x32xbf16, #tpu.memory_space<vmem>>, vector<32x32xbf16>
      %17 = arith.extf %16 : vector<32x32xbf16> to vector<32x32xf32>
      %18 = arith.addf %15, %17 : vector<32x32xf32>
      %cst_16 = arith.constant dense<0.000000e+00> : vector<32xf32>
      %19 = vector.multi_reduction <add>, %18, %cst_16 [1] : vector<32x32xf32> to vector<32xf32>
      %20 = vector.shape_cast %19 : vector<32xf32> to vector<32x1xf32>
      %cst_17 = arith.constant 3.200000e+01 : f32
      %21 = vector.broadcast %cst_17 : f32 to vector<32x1xf32>
      %22 = arith.divf %20, %21 : vector<32x1xf32>
      %23 = vector.broadcast %22 : vector<32x1xf32> to vector<32x32xf32>
      %24 = arith.subf %18, %23 : vector<32x32xf32>
      %25 = arith.mulf %24, %24 : vector<32x32xf32>
      %cst_18 = arith.constant dense<0.000000e+00> : vector<32xf32>
      %26 = vector.multi_reduction <add>, %25, %cst_18 [1] : vector<32x32xf32> to vector<32xf32>
      %27 = vector.shape_cast %26 : vector<32xf32> to vector<32x1xf32>
      %cst_19 = arith.constant 3.200000e+01 : f32
      %28 = vector.broadcast %cst_19 : f32 to vector<32x1xf32>
      %29 = arith.divf %27, %28 : vector<32x1xf32>
      %30 = vector.broadcast %22 : vector<32x1xf32> to vector<32x32xf32>
      %31 = arith.subf %18, %30 : vector<32x32xf32>
      %cst_20 = arith.constant 9.99999974E-6 : f32
      %32 = vector.broadcast %cst_20 : f32 to vector<32x1xf32>
      %33 = arith.addf %29, %32 : vector<32x1xf32>
      %34 = math.rsqrt %33 : vector<32x1xf32>
      %35 = vector.broadcast %34 : vector<32x1xf32> to vector<32x32xf32>
      %36 = arith.mulf %31, %35 : vector<32x32xf32>
      %c0_21 = arith.constant 0 : index
      %c0_22 = arith.constant 0 : index
      %37 = vector.load %arg6[%c0_21, %c0_22] : memref<1x32xf32, #tpu.memory_space<vmem>>, vector<1x32xf32>
      %38 = vector.broadcast %37 : vector<1x32xf32> to vector<32x32xf32>
      %39 = arith.mulf %36, %38 : vector<32x32xf32>
      %c0_23 = arith.constant 0 : index
      %c0_24 = arith.constant 0 : index
      %40 = vector.load %arg7[%c0_23, %c0_24] : memref<1x32xf32, #tpu.memory_space<vmem>>, vector<1x32xf32>
      %41 = vector.broadcast %40 : vector<1x32xf32> to vector<32x32xf32>
      %42 = arith.addf %39, %41 : vector<32x32xf32>
      %43 = arith.truncf %42 : vector<32x32xf32> to vector<32x32xbf16>
      %c0_25 = arith.constant 0 : index
      %c0_26 = arith.constant 0 : index
      %44 = vector.load %arg8[%c0_25, %c0_26] : memref<32x32xbf16, #tpu.memory_space<vmem>>, vector<32x32xbf16>
      tpu.vector_store %arg8[%c0_25, %c0_26], %43 {strides = array<i32>} : memref<32x32xbf16, #tpu.memory_space<vmem>>, vector<32x32xbf16>,
    } else {
    }
    return
  }
  func.func @transform_0(%arg0: i32, %arg1: i32) -> (i32, i32) {
    %c0_i32 = arith.constant 0 : i32
    return %arg0, %arg1 : i32, i32
  }
  func.func @transform_1(%arg0: i32, %arg1: i32) -> (i32, i32) {
    %c0_i32 = arith.constant 0 : i32
    %c0_i32_0 = arith.constant 0 : i32
    return %arg1, %c0_i32 : i32, i32
  }
  func.func @transform_2(%arg0: i32, %arg1: i32) -> (i32, i32) {
    %c0_i32 = arith.constant 0 : i32
    %c0_i32_0 = arith.constant 0 : i32
    %c0_i32_1 = arith.constant 0 : i32
    return %c0_i32, %c0_i32_0 : i32, i32
  }
  func.func @transform_3(%arg0: i32, %arg1: i32) -> (i32, i32) {
    %c0_i32 = arith.constant 0 : i32
    %c0_i32_0 = arith.constant 0 : i32
    return %arg0, %c0_i32 : i32, i32
  }
  func.func @transform_4(%arg0: i32, %arg1: i32) -> (i32, i32) {
    %c0_i32 = arith.constant 0 : i32
    %c0_i32_0 = arith.constant 0 : i32
    %c0_i32_1 = arith.constant 0 : i32
    return %c0_i32, %c0_i32_0 : i32, i32
  }
  func.func @transform_5(%arg0: i32, %arg1: i32) -> (i32, i32) {
    %c0_i32 = arith.constant 0 : i32
    %c0_i32_0 = arith.constant 0 : i32
    %c0_i32_1 = arith.constant 0 : i32
    return %c0_i32, %c0_i32_0 : i32, i32
  }
  func.func @transform_6(%arg0: i32, %arg1: i32) -> (i32, i32) {
    %c0_i32 = arith.constant 0 : i32
    %c0_i32_0 = arith.constant 0 : i32
    return %arg0, %c0_i32 : i32, i32
  }
}

module attributes {stable_mosaic.version = 11 : i64} {
  func.func @_linear_kernel(%arg0: i32, %arg1: i32, %arg2: memref<32x32xbf16, #tpu.memory_space<vmem>>, %arg3: memref<32x64xbf16, #tpu.memory_space<vmem>>, %arg4: memref<1x64xf32, #tpu.memory_space<vmem>>, %arg5: memref<32x64xbf16, #tpu.memory_space<vmem>>) attributes {dimension_semantics = [#tpu.dimension_semantics<parallel>, #tpu.dimension_semantics<parallel>], iteration_bounds = array<i64: 1, 1>, scalar_prefetch = 0 : i64, scratch_operands = 0 : i64, tpu.core_type = #tpu.core_type<tc>, window_params = [{transform_indices = @transform_0, window_bounds = array<i64: 32, 32>}, {transform_indices = @transform_1, window_bounds = array<i64: 32, 64>}, {transform_indices = @transform_2, window_bounds = array<i64: 1, 64>}, {transform_indices = @transform_3, window_bounds = array<i64: 32, 64>}]} {
    %c0 = arith.constant 0 : index
    %c0_0 = arith.constant 0 : index
    %0 = vector.load %arg2[%c0, %c0_0] : memref<32x32xbf16, #tpu.memory_space<vmem>>, vector<32x32xbf16>
    %c0_1 = arith.constant 0 : index
    %c0_2 = arith.constant 0 : index
    %1 = vector.load %arg3[%c0_1, %c0_2] : memref<32x64xbf16, #tpu.memory_space<vmem>>, vector<32x64xbf16>
    %cst = arith.constant dense<0.000000e+00> : vector<32x64xf32>
    %2 = tpu.matmul %0, %1, %cst {dimension_numbers = #tpu.dot_dimension_numbers<[1], [0], [0], [1], [0, 0, 1, 1], [], []>} : vector<32x32xbf16>, vector<32x64xbf16>, vector<32x64xf32> -> vector<32x64xf32>
    %c0_3 = arith.constant 0 : index
    %c0_4 = arith.constant 0 : index
    %3 = vector.load %arg4[%c0_3, %c0_4] : memref<1x64xf32, #tpu.memory_space<vmem>>, vector<1x64xf32>
    %4 = vector.broadcast %3 : vector<1x64xf32> to vector<32x64xf32>
    %5 = arith.addf %2, %4 : vector<32x64xf32>
    %6 = arith.mulf %5, %5 : vector<32x64xf32>
    %7 = arith.mulf %5, %6 : vector<32x64xf32>
    %cst_5 = arith.constant 4.471500e-02 : f32
    %8 = vector.broadcast %cst_5 : f32 to vector<32x64xf32>
    %9 = arith.mulf %8, %7 : vector<32x64xf32>
    %10 = arith.addf %5, %9 : vector<32x64xf32>
    %cst_6 = arith.constant 0.797884583 : f32
    %11 = vector.broadcast %cst_6 : f32 to vector<32x64xf32>
    %12 = arith.mulf %11, %10 : vector<32x64xf32>
    %13 = math.tanh %12 : vector<32x64xf32>
    %cst_7 = arith.constant 1.000000e+00 : f32
    %14 = vector.broadcast %cst_7 : f32 to vector<32x64xf32>
    %15 = arith.addf %14, %13 : vector<32x64xf32>
    %cst_8 = arith.constant 5.000000e-01 : f32
    %16 = vector.broadcast %cst_8 : f32 to vector<32x64xf32>
    %17 = arith.mulf %16, %15 : vector<32x64xf32>
    %18 = arith.mulf %5, %17 : vector<32x64xf32>
    %19 = arith.truncf %18 : vector<32x64xf32> to vector<32x64xbf16>
    %c0_9 = arith.constant 0 : index
    %c0_10 = arith.constant 0 : index
    %20 = vector.load %arg5[%c0_9, %c0_10] : memref<32x64xbf16, #tpu.memory_space<vmem>>, vector<32x64xbf16>
    tpu.vector_store %arg5[%c0_9, %c0_10], %19 {strides = array<i32>} : memref<32x64xbf16, #tpu.memory_space<vmem>>, vector<32x64xbf16>,
    return
  }
  func.func @transform_0(%arg0: i32, %arg1: i32) -> (i32, i32) {
    %c0_i32 = arith.constant 0 : i32
    %c0_i32_0 = arith.constant 0 : i32
    return %arg0, %c0_i32 : i32, i32
  }
  func.func @transform_1(%arg0: i32, %arg1: i32) -> (i32, i32) {
    %c0_i32 = arith.constant 0 : i32
    %c0_i32_0 = arith.constant 0 : i32
    return %c0_i32, %arg1 : i32, i32
  }
  func.func @transform_2(%arg0: i32, %arg1: i32) -> (i32, i32) {
    %c0_i32 = arith.constant 0 : i32
    %c0_i32_0 = arith.constant 0 : i32
    return %c0_i32, %arg1 : i32, i32
  }
  func.func @transform_3(%arg0: i32, %arg1: i32) -> (i32, i32) {
    %c0_i32 = arith.constant 0 : i32
    return %arg0, %arg1 : i32, i32
  }
}

module attributes {stable_mosaic.version = 11 : i64} {
  func.func @_attn_kernel(%arg0: i32, %arg1: memref<1x8x32xbf16, #tpu.memory_space<vmem>>, %arg2: memref<32x96xbf16, #tpu.memory_space<vmem>>, %arg3: memref<1x96xf32, #tpu.memory_space<vmem>>, %arg4: memref<1x1x8xf32, #tpu.memory_space<vmem>>, %arg5: memref<1x8x32xbf16, #tpu.memory_space<vmem>>, %arg6: memref<8x32xf32, #tpu.memory_space<vmem>>) attributes {dimension_semantics = [#tpu.dimension_semantics<parallel>], iteration_bounds = array<i64: 4>, scalar_prefetch = 0 : i64, scratch_operands = 1 : i64, tpu.core_type = #tpu.core_type<tc>, window_params = [{transform_indices = @transform_0, window_bounds = array<i64: 1, 8, 32>}, {pipeline_mode = #tpu.pipeline_mode<synchronous>, transform_indices = @transform_1, window_bounds = array<i64: 32, 96>}, {pipeline_mode = #tpu.pipeline_mode<synchronous>, transform_indices = @transform_2, window_bounds = array<i64: 1, 96>}, {transform_indices = @transform_3, window_bounds = array<i64: 1, 1, 8>}, {transform_indices = @transform_4, window_bounds = array<i64: 1, 8, 32>}]} {
    %c0 = arith.constant 0 : index
    %c0_0 = arith.constant 0 : index
    %c0_1 = arith.constant 0 : index
    %0 = vector.load %arg1[%c0, %c0_0, %c0_1] : memref<1x8x32xbf16, #tpu.memory_space<vmem>>, vector<1x8x32xbf16>
    %1 = vector.shape_cast %0 : vector<1x8x32xbf16> to vector<8x32xbf16>
    %c0_2 = arith.constant 0 : index
    %c0_3 = arith.constant 0 : index
    %c0_4 = arith.constant 0 : index
    %2 = vector.load %arg4[%c0_2, %c0_3, %c0_4] : memref<1x1x8xf32, #tpu.memory_space<vmem>>, vector<1x1x8xf32>
    %3 = vector.shape_cast %2 : vector<1x1x8xf32> to vector<1x8xf32>
    %c0_5 = arith.constant 0 : index
    %c0_6 = arith.constant 0 : index
    %4 = vector.load %arg2[%c0_5, %c0_6] : memref<32x96xbf16, #tpu.memory_space<vmem>>, vector<32x96xbf16>
    %cst = arith.constant dense<0.000000e+00> : vector<8x96xf32>
    %5 = tpu.matmul %1, %4, %cst {dimension_numbers = #tpu.dot_dimension_numbers<[1], [0], [0], [1], [0, 0, 1, 1], [], []>} : vector<8x32xbf16>, vector<32x96xbf16>, vector<8x96xf32> -> vector<8x96xf32>
    %c0_7 = arith.constant 0 : index
    %c0_8 = arith.constant 0 : index
    %6 = vector.load %arg3[%c0_7, %c0_8] : memref<1x96xf32, #tpu.memory_space<vmem>>, vector<1x96xf32>
    %7 = vector.broadcast %6 : vector<1x96xf32> to vector<8x96xf32>
    %8 = arith.addf %5, %7 : vector<8x96xf32>
    %9 = arith.truncf %8 : vector<8x96xf32> to vector<8x96xbf16>
    %10 = vector.extract_strided_slice %9 {offsets = [0, 0], sizes = [8, 32], strides = [1, 1]} : vector<8x96xbf16> to vector<8x32xbf16>
    %11 = vector.extract_strided_slice %9 {offsets = [0, 32], sizes = [8, 32], strides = [1, 1]} : vector<8x96xbf16> to vector<8x32xbf16>
    %12 = vector.extract_strided_slice %9 {offsets = [0, 64], sizes = [8, 32], strides = [1, 1]} : vector<8x96xbf16> to vector<8x32xbf16>
    %13 = vector.extract_strided_slice %10 {offsets = [0, 0], sizes = [8, 16], strides = [1, 1]} : vector<8x32xbf16> to vector<8x16xbf16>
    %14 = vector.extract_strided_slice %11 {offsets = [0, 0], sizes = [8, 16], strides = [1, 1]} : vector<8x32xbf16> to vector<8x16xbf16>
    %15 = vector.extract_strided_slice %12 {offsets = [0, 0], sizes = [8, 16], strides = [1, 1]} : vector<8x32xbf16> to vector<8x16xbf16>
    %cst_9 = arith.constant dense<0.000000e+00> : vector<8x8xf32>
    %16 = tpu.matmul %13, %14, %cst_9 {dimension_numbers = #tpu.dot_dimension_numbers<[1], [1], [0], [0], [0, 0, 1, 0], [], []>} : vector<8x16xbf16>, vector<8x16xbf16>, vector<8x8xf32> -> vector<8x8xf32>
    %cst_10 = arith.constant 0.000000e+00 : f32
    %17 = vector.broadcast %cst_10 : f32 to vector<1x8xf32>
    %18 = arith.cmpf ogt, %3, %17 : vector<1x8xf32>
    %cst_11 = arith.constant -1.000000e+09 : f32
    %19 = vector.shape_cast %18 : vector<1x8xi1> to vector<1x8xi1>
    %20 = vector.broadcast %19 : vector<1x8xi1> to vector<8x8xi1>
    %21 = vector.broadcast %cst_11 : f32 to vector<8x8xf32>
    %22 = arith.select %20, %16, %21 : vector<8x8xi1>, vector<8x8xf32>
    %cst_12 = arith.constant dense<0xFF800000> : vector<8xf32>
    %23 = vector.multi_reduction <maximumf>, %22, %cst_12 [1] : vector<8x8xf32> to vector<8xf32>
    %24 = vector.shape_cast %23 : vector<8xf32> to vector<8x1xf32>
    %25 = vector.broadcast %24 : vector<8x1xf32> to vector<8x8xf32>
    %26 = arith.subf %22, %25 : vector<8x8xf32>
    %27 = math.exp %26 : vector<8x8xf32>
    %cst_13 = arith.constant dense<0.000000e+00> : vector<8xf32>
    %28 = vector.multi_reduction <add>, %27, %cst_13 [1] : vector<8x8xf32> to vector<8xf32>
    %29 = vector.shape_cast %28 : vector<8xf32> to vector<8x1xf32>
    %30 = tpu.reciprocal %29 {approx = true} : vector<8x1xf32> -> vector<8x1xf32>
    %31 = vector.broadcast %30 : vector<8x1xf32> to vector<8x8xf32>
    %32 = arith.mulf %27, %31 : vector<8x8xf32>
    %33 = arith.truncf %32 : vector<8x8xf32> to vector<8x8xbf16>
    %cst_14 = arith.constant dense<0.000000e+00> : vector<8x16xf32>
    %34 = tpu.matmul %33, %15, %cst_14 {dimension_numbers = #tpu.dot_dimension_numbers<[1], [0], [0], [1], [0, 0, 1, 1], [], []>} : vector<8x8xbf16>, vector<8x16xbf16>, vector<8x16xf32> -> vector<8x16xf32>
    %c0_15 = arith.constant 0 : index
    %c0_16 = arith.constant 0 : index
    %35 = vector.load %arg6[%c0_15, %c0_16] : memref<8x32xf32, #tpu.memory_space<vmem>>, vector<8x16xf32>
    tpu.vector_store %arg6[%c0_15, %c0_16], %34 {strides = array<i32>} : memref<8x32xf32, #tpu.memory_space<vmem>>, vector<8x16xf32>,
    %36 = vector.extract_strided_slice %10 {offsets = [0, 16], sizes = [8, 16], strides = [1, 1]} : vector<8x32xbf16> to vector<8x16xbf16>
    %37 = vector.extract_strided_slice %11 {offsets = [0, 16], sizes = [8, 16], strides = [1, 1]} : vector<8x32xbf16> to vector<8x16xbf16>
    %38 = vector.extract_strided_slice %12 {offsets = [0, 16], sizes = [8, 16], strides = [1, 1]} : vector<8x32xbf16> to vector<8x16xbf16>
    %cst_17 = arith.constant dense<0.000000e+00> : vector<8x8xf32>
    %39 = tpu.matmul %36, %37, %cst_17 {dimension_numbers = #tpu.dot_dimension_numbers<[1], [1], [0], [0], [0, 0, 1, 0], [], []>} : vector<8x16xbf16>, vector<8x16xbf16>, vector<8x8xf32> -> vector<8x8xf32>
    %cst_18 = arith.constant 0.000000e+00 : f32
    %40 = vector.broadcast %cst_18 : f32 to vector<1x8xf32>
    %41 = arith.cmpf ogt, %3, %40 : vector<1x8xf32>
    %cst_19 = arith.constant -1.000000e+09 : f32
    %42 = vector.shape_cast %41 : vector<1x8xi1> to vector<1x8xi1>
    %43 = vector.broadcast %42 : vector<1x8xi1> to vector<8x8xi1>
    %44 = vector.broadcast %cst_19 : f32 to vector<8x8xf32>
    %45 = arith.select %43, %39, %44 : vector<8x8xi1>, vector<8x8xf32>
    %cst_20 = arith.constant dense<0xFF800000> : vector<8xf32>
    %46 = vector.multi_reduction <maximumf>, %45, %cst_20 [1] : vector<8x8xf32> to vector<8xf32>
    %47 = vector.shape_cast %46 : vector<8xf32> to vector<8x1xf32>
    %48 = vector.broadcast %47 : vector<8x1xf32> to vector<8x8xf32>
    %49 = arith.subf %45, %48 : vector<8x8xf32>
    %50 = math.exp %49 : vector<8x8xf32>
    %cst_21 = arith.constant dense<0.000000e+00> : vector<8xf32>
    %51 = vector.multi_reduction <add>, %50, %cst_21 [1] : vector<8x8xf32> to vector<8xf32>
    %52 = vector.shape_cast %51 : vector<8xf32> to vector<8x1xf32>
    %53 = tpu.reciprocal %52 {approx = true} : vector<8x1xf32> -> vector<8x1xf32>
    %54 = vector.broadcast %53 : vector<8x1xf32> to vector<8x8xf32>
    %55 = arith.mulf %50, %54 : vector<8x8xf32>
    %56 = arith.truncf %55 : vector<8x8xf32> to vector<8x8xbf16>
    %cst_22 = arith.constant dense<0.000000e+00> : vector<8x16xf32>
    %57 = tpu.matmul %56, %38, %cst_22 {dimension_numbers = #tpu.dot_dimension_numbers<[1], [0], [0], [1], [0, 0, 1, 1], [], []>} : vector<8x8xbf16>, vector<8x16xbf16>, vector<8x16xf32> -> vector<8x16xf32>
    %c0_23 = arith.constant 0 : index
    %c16 = arith.constant 16 : index
    %58 = vector.load %arg6[%c0_23, %c16] : memref<8x32xf32, #tpu.memory_space<vmem>>, vector<8x16xf32>
    tpu.vector_store %arg6[%c0_23, %c16], %57 {strides = array<i32>} : memref<8x32xf32, #tpu.memory_space<vmem>>, vector<8x16xf32>,
    %c0_24 = arith.constant 0 : index
    %c0_25 = arith.constant 0 : index
    %59 = vector.load %arg6[%c0_24, %c0_25] : memref<8x32xf32, #tpu.memory_space<vmem>>, vector<8x32xf32>
    %60 = arith.truncf %59 : vector<8x32xf32> to vector<8x32xbf16>
    %c0_26 = arith.constant 0 : index
    %c0_27 = arith.constant 0 : index
    %c0_28 = arith.constant 0 : index
    %61 = vector.load %arg5[%c0_26, %c0_27, %c0_28] : memref<1x8x32xbf16, #tpu.memory_space<vmem>>, vector<1x8x32xbf16>
    %62 = vector.shape_cast %61 : vector<1x8x32xbf16> to vector<8x32xbf16>
    %63 = vector.shape_cast %60 : vector<8x32xbf16> to vector<1x8x32xbf16>
    tpu.vector_store %arg5[%c0_26, %c0_27, %c0_28], %63 {strides = array<i32>} : memref<1x8x32xbf16, #tpu.memory_space<vmem>>, vector<1x8x32xbf16>,
    return
  }
  func.func @transform_0(%arg0: i32) -> (i32, i32, i32) {
    %c0_i32 = arith.constant 0 : i32
    %c0_i32_0 = arith.constant 0 : i32
    %c0_i32_1 = arith.constant 0 : i32
    return %arg0, %c0_i32, %c0_i32_0 : i32, i32, i32
  }
  func.func @transform_1(%arg0: i32) -> (i32, i32) {
    %c0_i32 = arith.constant 0 : i32
    %c0_i32_0 = arith.constant 0 : i32
    %c0_i32_1 = arith.constant 0 : i32
    return %c0_i32, %c0_i32_0 : i32, i32
  }
  func.func @transform_2(%arg0: i32) -> (i32, i32) {
    %c0_i32 = arith.constant 0 : i32
    %c0_i32_0 = arith.constant 0 : i32
    %c0_i32_1 = arith.constant 0 : i32
    return %c0_i32, %c0_i32_0 : i32, i32
  }
  func.func @transform_3(%arg0: i32) -> (i32, i32, i32) {
    %c0_i32 = arith.constant 0 : i32
    %c0_i32_0 = arith.constant 0 : i32
    %c0_i32_1 = arith.constant 0 : i32
    return %arg0, %c0_i32, %c0_i32_0 : i32, i32, i32
  }
  func.func @transform_4(%arg0: i32) -> (i32, i32, i32) {
    %c0_i32 = arith.constant 0 : i32
    %c0_i32_0 = arith.constant 0 : i32
    %c0_i32_1 = arith.constant 0 : i32
    return %arg0, %c0_i32, %c0_i32_0 : i32, i32, i32
  }
}

module attributes {stable_mosaic.version = 11 : i64} {
  func.func @_linear_res_ln_kernel(%arg0: i32, %arg1: i32, %arg2: memref<32x64xbf16, #tpu.memory_space<vmem>>, %arg3: memref<64x32xbf16, #tpu.memory_space<vmem>>, %arg4: memref<1x32xf32, #tpu.memory_space<vmem>>, %arg5: memref<32x32xbf16, #tpu.memory_space<vmem>>, %arg6: memref<1x32xf32, #tpu.memory_space<vmem>>, %arg7: memref<1x32xf32, #tpu.memory_space<vmem>>, %arg8: memref<32x32xbf16, #tpu.memory_space<vmem>>, %arg9: memref<32x32xf32, #tpu.memory_space<vmem>>) attributes {dimension_semantics = [#tpu.dimension_semantics<parallel>, #tpu.dimension_semantics<arbitrary>], iteration_bounds = array<i64: 1, 1>, scalar_prefetch = 0 : i64, scratch_operands = 1 : i64, tpu.core_type = #tpu.core_type<tc>, window_params = [{transform_indices = @transform_0, window_bounds = array<i64: 32, 64>}, {transform_indices = @transform_1, window_bounds = array<i64: 64, 32>}, {pipeline_mode = #tpu.pipeline_mode<synchronous>, transform_indices = @transform_2, window_bounds = array<i64: 1, 32>}, {transform_indices = @transform_3, window_bounds = array<i64: 32, 32>}, {pipeline_mode = #tpu.pipeline_mode<synchronous>, transform_indices = @transform_4, window_bounds = array<i64: 1, 32>}, {pipeline_mode = #tpu.pipeline_mode<synchronous>, transform_indices = @transform_5, window_bounds = array<i64: 1, 32>}, {transform_indices = @transform_6, window_bounds = array<i64: 32, 32>}]} {
    %c0_i32 = arith.constant 0 : i32
    %0 = arith.cmpi eq, %arg1, %c0_i32 : i32
    %1 = arith.extui %0 : i1 to i32
    %c0_i32_0 = arith.constant 0 : i32
    %2 = arith.cmpi ne, %1, %c0_i32_0 : i32
    scf.if %2 {
      %cst_10 = arith.constant 0.000000e+00 : f32
      %12 = vector.broadcast %cst_10 : f32 to vector<32x32xf32>
      %c0_11 = arith.constant 0 : index
      %c0_12 = arith.constant 0 : index
      %13 = vector.load %arg9[%c0_11, %c0_12] : memref<32x32xf32, #tpu.memory_space<vmem>>, vector<32x32xf32>
      tpu.vector_store %arg9[%c0_11, %c0_12], %12 {strides = array<i32>} : memref<32x32xf32, #tpu.memory_space<vmem>>, vector<32x32xf32>,
    } else {
    }
    %c0 = arith.constant 0 : index
    %c0_1 = arith.constant 0 : index
    %3 = vector.load %arg9[%c0, %c0_1] : memref<32x32xf32, #tpu.memory_space<vmem>>, vector<32x32xf32>
    %c0_2 = arith.constant 0 : index
    %c0_3 = arith.constant 0 : index
    %4 = vector.load %arg2[%c0_2, %c0_3] : memref<32x64xbf16, #tpu.memory_space<vmem>>, vector<32x64xbf16>
    %c0_4 = arith.constant 0 : index
    %c0_5 = arith.constant 0 : index
    %5 = vector.load %arg3[%c0_4, %c0_5] : memref<64x32xbf16, #tpu.memory_space<vmem>>, vector<64x32xbf16>
    %cst = arith.constant dense<0.000000e+00> : vector<32x32xf32>
    %6 = tpu.matmul %4, %5, %cst {dimension_numbers = #tpu.dot_dimension_numbers<[1], [0], [0], [1], [0, 0, 1, 1], [], []>} : vector<32x64xbf16>, vector<64x32xbf16>, vector<32x32xf32> -> vector<32x32xf32>
    %7 = arith.addf %3, %6 : vector<32x32xf32>
    %c0_6 = arith.constant 0 : index
    %c0_7 = arith.constant 0 : index
    %8 = vector.load %arg9[%c0_6, %c0_7] : memref<32x32xf32, #tpu.memory_space<vmem>>, vector<32x32xf32>
    tpu.vector_store %arg9[%c0_6, %c0_7], %7 {strides = array<i32>} : memref<32x32xf32, #tpu.memory_space<vmem>>, vector<32x32xf32>,
    %c0_i32_8 = arith.constant 0 : i32
    %9 = arith.cmpi eq, %arg1, %c0_i32_8 : i32
    %10 = arith.extui %9 : i1 to i32
    %c0_i32_9 = arith.constant 0 : i32
    %11 = arith.cmpi ne, %10, %c0_i32_9 : i32
    scf.if %11 {
      %c0_10 = arith.constant 0 : index
      %c0_11 = arith.constant 0 : index
      %12 = vector.load %arg9[%c0_10, %c0_11] : memref<32x32xf32, #tpu.memory_space<vmem>>, vector<32x32xf32>
      %c0_12 = arith.constant 0 : index
      %c0_13 = arith.constant 0 : index
      %13 = vector.load %arg4[%c0_12, %c0_13] : memref<1x32xf32, #tpu.memory_space<vmem>>, vector<1x32xf32>
      %14 = vector.broadcast %13 : vector<1x32xf32> to vector<32x32xf32>
      %15 = arith.addf %12, %14 : vector<32x32xf32>
      %c0_14 = arith.constant 0 : index
      %c0_15 = arith.constant 0 : index
      %16 = vector.load %arg5[%c0_14, %c0_15] : memref<32x32xbf16, #tpu.memory_space<vmem>>, vector<32x32xbf16>
      %17 = arith.extf %16 : vector<32x32xbf16> to vector<32x32xf32>
      %18 = arith.addf %15, %17 : vector<32x32xf32>
      %cst_16 = arith.constant dense<0.000000e+00> : vector<32xf32>
      %19 = vector.multi_reduction <add>, %18, %cst_16 [1] : vector<32x32xf32> to vector<32xf32>
      %20 = vector.shape_cast %19 : vector<32xf32> to vector<32x1xf32>
      %cst_17 = arith.constant 3.200000e+01 : f32
      %21 = vector.broadcast %cst_17 : f32 to vector<32x1xf32>
      %22 = arith.divf %20, %21 : vector<32x1xf32>
      %23 = vector.broadcast %22 : vector<32x1xf32> to vector<32x32xf32>
      %24 = arith.subf %18, %23 : vector<32x32xf32>
      %25 = arith.mulf %24, %24 : vector<32x32xf32>
      %cst_18 = arith.constant dense<0.000000e+00> : vector<32xf32>
      %26 = vector.multi_reduction <add>, %25, %cst_18 [1] : vector<32x32xf32> to vector<32xf32>
      %27 = vector.shape_cast %26 : vector<32xf32> to vector<32x1xf32>
      %cst_19 = arith.constant 3.200000e+01 : f32
      %28 = vector.broadcast %cst_19 : f32 to vector<32x1xf32>
      %29 = arith.divf %27, %28 : vector<32x1xf32>
      %30 = vector.broadcast %22 : vector<32x1xf32> to vector<32x32xf32>
      %31 = arith.subf %18, %30 : vector<32x32xf32>
      %cst_20 = arith.constant 9.99999974E-6 : f32
      %32 = vector.broadcast %cst_20 : f32 to vector<32x1xf32>
      %33 = arith.addf %29, %32 : vector<32x1xf32>
      %34 = math.rsqrt %33 : vector<32x1xf32>
      %35 = vector.broadcast %34 : vector<32x1xf32> to vector<32x32xf32>
      %36 = arith.mulf %31, %35 : vector<32x32xf32>
      %c0_21 = arith.constant 0 : index
      %c0_22 = arith.constant 0 : index
      %37 = vector.load %arg6[%c0_21, %c0_22] : memref<1x32xf32, #tpu.memory_space<vmem>>, vector<1x32xf32>
      %38 = vector.broadcast %37 : vector<1x32xf32> to vector<32x32xf32>
      %39 = arith.mulf %36, %38 : vector<32x32xf32>
      %c0_23 = arith.constant 0 : index
      %c0_24 = arith.constant 0 : index
      %40 = vector.load %arg7[%c0_23, %c0_24] : memref<1x32xf32, #tpu.memory_space<vmem>>, vector<1x32xf32>
      %41 = vector.broadcast %40 : vector<1x32xf32> to vector<32x32xf32>
      %42 = arith.addf %39, %41 : vector<32x32xf32>
      %43 = arith.truncf %42 : vector<32x32xf32> to vector<32x32xbf16>
      %c0_25 = arith.constant 0 : index
      %c0_26 = arith.constant 0 : index
      %44 = vector.load %arg8[%c0_25, %c0_26] : memref<32x32xbf16, #tpu.memory_space<vmem>>, vector<32x32xbf16>
      tpu.vector_store %arg8[%c0_25, %c0_26], %43 {strides = array<i32>} : memref<32x32xbf16, #tpu.memory_space<vmem>>, vector<32x32xbf16>,
    } else {
    }
    return
  }
  func.func @transform_0(%arg0: i32, %arg1: i32) -> (i32, i32) {
    %c0_i32 = arith.constant 0 : i32
    return %arg0, %arg1 : i32, i32
  }
  func.func @transform_1(%arg0: i32, %arg1: i32) -> (i32, i32) {
    %c0_i32 = arith.constant 0 : i32
    %c0_i32_0 = arith.constant 0 : i32
    return %arg1, %c0_i32 : i32, i32
  }
  func.func @transform_2(%arg0: i32, %arg1: i32) -> (i32, i32) {
    %c0_i32 = arith.constant 0 : i32
    %c0_i32_0 = arith.constant 0 : i32
    %c0_i32_1 = arith.constant 0 : i32
    return %c0_i32, %c0_i32_0 : i32, i32
  }
  func.func @transform_3(%arg0: i32, %arg1: i32) -> (i32, i32) {
    %c0_i32 = arith.constant 0 : i32
    %c0_i32_0 = arith.constant 0 : i32
    return %arg0, %c0_i32 : i32, i32
  }
  func.func @transform_4(%arg0: i32, %arg1: i32) -> (i32, i32) {
    %c0_i32 = arith.constant 0 : i32
    %c0_i32_0 = arith.constant 0 : i32
    %c0_i32_1 = arith.constant 0 : i32
    return %c0_i32, %c0_i32_0 : i32, i32
  }
  func.func @transform_5(%arg0: i32, %arg1: i32) -> (i32, i32) {
    %c0_i32 = arith.constant 0 : i32
    %c0_i32_0 = arith.constant 0 : i32
    %c0_i32_1 = arith.constant 0 : i32
    return %c0_i32, %c0_i32_0 : i32, i32
  }
  func.func @transform_6(%arg0: i32, %arg1: i32) -> (i32, i32) {
    %c0_i32 = arith.constant 0 : i32
    %c0_i32_0 = arith.constant 0 : i32
    return %arg0, %c0_i32 : i32, i32
  }
}

module attributes {stable_mosaic.version = 11 : i64} {
  func.func @_head_kernel(%arg0: memref<2x64xbf16, #tpu.memory_space<vmem>>, %arg1: memref<64x256xbf16, #tpu.memory_space<vmem>>, %arg2: memref<1x256xf32, #tpu.memory_space<vmem>>, %arg3: memref<256x128xbf16, #tpu.memory_space<vmem>>, %arg4: memref<1x128xf32, #tpu.memory_space<vmem>>, %arg5: memref<2x128xf32, #tpu.memory_space<vmem>>) attributes {dimension_semantics = [], scalar_prefetch = 0 : i64, scratch_operands = 0 : i64, tpu.core_type = #tpu.core_type<tc>} {
    %c0 = arith.constant 0 : index
    %c0_0 = arith.constant 0 : index
    %0 = vector.load %arg0[%c0, %c0_0] : memref<2x64xbf16, #tpu.memory_space<vmem>>, vector<2x64xbf16>
    %c0_1 = arith.constant 0 : index
    %c0_2 = arith.constant 0 : index
    %1 = vector.load %arg1[%c0_1, %c0_2] : memref<64x256xbf16, #tpu.memory_space<vmem>>, vector<64x256xbf16>
    %cst = arith.constant dense<0.000000e+00> : vector<2x256xf32>
    %2 = tpu.matmul %0, %1, %cst {dimension_numbers = #tpu.dot_dimension_numbers<[1], [0], [0], [1], [0, 0, 1, 1], [], []>} : vector<2x64xbf16>, vector<64x256xbf16>, vector<2x256xf32> -> vector<2x256xf32>
    %c0_3 = arith.constant 0 : index
    %c0_4 = arith.constant 0 : index
    %3 = vector.load %arg2[%c0_3, %c0_4] : memref<1x256xf32, #tpu.memory_space<vmem>>, vector<1x256xf32>
    %4 = vector.broadcast %3 : vector<1x256xf32> to vector<2x256xf32>
    %5 = arith.addf %2, %4 : vector<2x256xf32>
    %cst_5 = arith.constant 0.000000e+00 : f32
    %6 = vector.broadcast %cst_5 : f32 to vector<2x256xf32>
    %7 = arith.maximumf %5, %6 : vector<2x256xf32>
    %8 = arith.truncf %7 : vector<2x256xf32> to vector<2x256xbf16>
    %c0_6 = arith.constant 0 : index
    %c0_7 = arith.constant 0 : index
    %9 = vector.load %arg3[%c0_6, %c0_7] : memref<256x128xbf16, #tpu.memory_space<vmem>>, vector<256x128xbf16>
    %cst_8 = arith.constant dense<0.000000e+00> : vector<2x128xf32>
    %10 = tpu.matmul %8, %9, %cst_8 {dimension_numbers = #tpu.dot_dimension_numbers<[1], [0], [0], [1], [0, 0, 1, 1], [], []>} : vector<2x256xbf16>, vector<256x128xbf16>, vector<2x128xf32> -> vector<2x128xf32>
    %c0_9 = arith.constant 0 : index
    %c0_10 = arith.constant 0 : index
    %11 = vector.load %arg4[%c0_9, %c0_10] : memref<1x128xf32, #tpu.memory_space<vmem>>, vector<1x128xf32>
    %12 = vector.broadcast %11 : vector<1x128xf32> to vector<2x128xf32>
    %13 = arith.addf %10, %12 : vector<2x128xf32>
    %c0_11 = arith.constant 0 : index
    %c0_12 = arith.constant 0 : index
    %14 = vector.load %arg5[%c0_11, %c0_12] : memref<2x128xf32, #tpu.memory_space<vmem>>, vector<2x128xf32>
    tpu.vector_store %arg5[%c0_11, %c0_12], %13 {strides = array<i32>} : memref<2x128xf32, #tpu.memory_space<vmem>>, vector<2x128xf32>,
    return
  }
}

</mosaic_0001>

<bundles_post_ra>
// kernel: siamese_forward.10
= control target key start
LH: loop header
LB: loop body
LE: loop exit
PB: predicated region body
PF: predicated region fallthrough
CT: control target
= control target key end

     0   :  { %8 = vsyncpa [#allocation3], 0  ;;  %s386_s0 = inlined_call_operand.hbm [shape: f32[32,32], index: 0, kind: input, shape index: {}]   ;;  %s387_s1 = inlined_call_operand.hbm [shape: f32[1,32], index: 1, kind: input, shape index: {}]   ;;  %s388_s2 = inlined_call_operand.hbm [shape: f32[1,32], index: 2, kind: input, shape index: {}]   ;;  %s389_s3 = inlined_call_operand.hbm [shape: bf16[32,32], index: 3, kind: output, shape index: {}]  }
   0x1   :  { %9 = vsyncpa [#allocation6], 0 }
   0x2   :  { %10 = vsyncpa [#allocation4], 0  ;;  %s291_s12 = smov [#allocation5]   ;;  %s292_s14 = smov [#allocation2]  }
   0x3   :  { %s29_s13 = sshll.u32 %s291_s12, 4  ;;  %s16_s15 = sshll.u32 %s292_s14, 4  ;;  %s30_s13 = int_to_ptr.vmem [resolvable:$true] %s29_s13  ;;  %s319_s15 = int_to_ptr.vmem [resolvable:$true] %s16_s15 }
   0x4   :  { %s197_s18 = scalar_lea.hbm %s387_s1, 16 }
   0x5   :  { %p198_p0 = scmp.ne.s32.totalorder %s387_s1, %s197_s18  ;;  %p201_p1 = scmp.lt.u32.totalorder %s197_s18, %s387_s1 }
   0x7   :  { %p203_p2 = pnand %p201_p1, %p198_p0 }
   0x9   :  { %206 = shalt.err (!%p203_p2)
}
   0xa   :  { %s207_s23 = scalar_lea.vmem %s30_s13, 16  ;;  %s211_s24 = scalar_lea.vmem %s30_s13, 32 }
   0xb   :  { %p208_p3 = scmp.ne.s32.totalorder %s30_s13, %s207_s23  ;;  %p212_p4 = scmp.lt.s32.totalorder %s30_s13, %s30_s13 }
   0xc   :  { %p213_p5 = scmp.lt.s32.totalorder %s211_s24, %s207_s23 }
   0xe   :  { %p214_p6 = por %p213_p5, %p212_p4 }
  0x10   :  { %p215_p7 = pnand %p214_p6, %p208_p3 }
  0x12   :  { %218 = shalt.err (!%p215_p7)
}
  0x13   :  { %32 = dma.hbm_to_vmem [thread:$0]  %s387_s1, 16, %s30_s13, [#allocation6]  }
  0x14   :  { %s219_s29 = scalar_lea.hbm %s386_s0, 512 }
  0x15   :  { %p220_p8 = scmp.ne.s32.totalorder %s386_s0, %s219_s29  ;;  %p223_p9 = scmp.lt.u32.totalorder %s219_s29, %s386_s0 }
  0x17   :  { %p225_p10 = pnand %p223_p9, %p220_p8 }
  0x19   :  { %228 = shalt.err (!%p225_p10)
}
  0x1a   :  { %s229_s7 = scalar_lea.vmem %s319_s15, 512  ;;  %p234_p12 = scmp.lt.s32.totalorder %s319_s15, %s319_s15 }
  0x1b   :  { %p230_p11 = scmp.ne.s32.totalorder %s319_s15, %s229_s7  ;;  %p235_p13 = scmp.lt.s32.totalorder %s229_s7, %s229_s7 }
  0x1d   :  { %p236_p0 = por %p235_p13, %p234_p12 }
  0x1f   :  { %p237_p1 = pnand %p236_p0, %p230_p11 }
  0x21   :  { %240 = shalt.err (!%p237_p1)
}
  0x22   :  { %s293_s1 = smov 128   ;;  %s294_s8 = smov 8  }
  0x23   :  { %22 = dma.hbm_to_vmem [thread:$0]  %s386_s0, 512, %s319_s15, [#allocation3], %s293_s1, %s293_s1, %s294_s8  }
  0x24   :  { %s295_s11 = smov [#allocation7]   ;;  %s241_s16 = scalar_lea.hbm %s388_s2, 16 }
  0x25   :  { %s39_s12 = sshll.u32 %s295_s11, 4  ;;  %p242_p2 = scmp.ne.s32.totalorder %s388_s2, %s241_s16  ;;  %s40_s12 = int_to_ptr.vmem [resolvable:$true] %s39_s12 }
  0x26   :  { %p245_p3 = scmp.lt.u32.totalorder %s241_s16, %s388_s2 }
  0x28   :  { %p247_p4 = pnand %p245_p3, %p242_p2 }
  0x2a   :  { %250 = shalt.err (!%p247_p4)
}
  0x2b   :  { %s251_s21 = scalar_lea.vmem %s40_s12, 16  ;;  %s255_s0 = scalar_lea.vmem %s40_s12, 32 }
  0x2c   :  { %p252_p5 = scmp.ne.s32.totalorder %s40_s12, %s251_s21  ;;  %p256_p6 = scmp.lt.s32.totalorder %s40_s12, %s40_s12 }
  0x2d   :  { %p257_p7 = scmp.lt.s32.totalorder %s255_s0, %s251_s21 }
  0x2f   :  { %p258_p8 = por %p257_p7, %p256_p6 }
  0x31   :  { %p259_p9 = pnand %p258_p8, %p252_p5 }
  0x33   :  { %262 = shalt.err (!%p259_p9)
}
  0x34   :  { %42 = dma.hbm_to_vmem [thread:$0]  %s388_s2, 16, %s40_s12, [#allocation6]  }
  0x35   :  { %285 = dma.done.wait [#allocation3], 512  }
  0x36   :  { %286 = vsyncadd [#allocation3], 4294966784 }
  0x37   :  { %287 = dma.done.wait [#allocation6], 32  }
  0x38   :  { %288 = vsyncadd [#allocation6], 4294967264  ;;  %vm56_vm0 = vcmask 261120   ;;  %v52_v0 = vld [vmem:[#allocation2] sm:$0xff]  ;;  %v54_v1 = vld [vmem:[#allocation2 + $0x10] sm:$0xff]  ;;  %vm148_vm1 = vcmask 257024  }
  0x39   :  { %v53_v2 = vld [vmem:[#allocation2 + $0x8] sm:$0xff]  ;;  %v57_v3 = vsel %vm56_vm0, %v52_v0, 0.0  ;;  %v63_v4 = vsel %vm56_vm0, %v54_v1, 0.0  ;;  %v55_v5 = vld [vmem:[#allocation2 + $0x18] sm:$0xff]  ;;  %v171_v41 = vld [vmem:[#allocation5] ss:$0 sm:$0xff] }
  0x3a   :  { %58 = vadd.xlane.f32.xlu0 %v57_v3  ;;  %64 = vadd.xlane.f32.xlu1 %v63_v4  ;;  %v60_v6 = vsel %vm56_vm0, %v53_v2, 0.0  ;;  %v66_v7 = vsel %vm56_vm0, %v55_v5, 0.0  ;;  %v172_v43 = vld [vmem:[#allocation7] ss:$0 sm:$0xff]  ;;  %s296_s2 = smov [#allocation8]  }
  0x3b   :  { %s158_s23 = sshll.u32 %s296_s2, 4  ;;  %s159_s23 = int_to_ptr.vmem [resolvable:$true] %s158_s23 }
  0x3c   :  { %s263_s24 = scalar_lea.vmem %s159_s23, 256  ;;  %p268_p11 = scmp.lt.s32.totalorder %s159_s23, %s159_s23 }
  0x3d   :  { %p264_p10 = scmp.ne.s32.totalorder %s159_s23, %s263_s24  ;;  %p269_p12 = scmp.lt.s32.totalorder %s263_s24, %s263_s24 }
  0x3e   :  { %61 = vadd.xlane.f32.xlu0 %v60_v6  ;;  %67 = vadd.xlane.f32.xlu1 %v66_v7 }
  0x3f   :  { %p270_p13 = por %p269_p12, %p268_p11 }
  0x41   :  { %p271_p0 = pnand %p270_p13, %p264_p10 }
  0xc7   :  { %v59_v8 = vpop.xlane.xlu0 %58  ;;  %v65_v9 = vpop.xlane.xlu1 %64 }
  0xc8   :  { %v70_v10 = vmul.f32 0.03125, %v59_v8  ;;  %v72_v11 = vmul.f32 0.03125, %v65_v9 }
  0xca   :  { %v74_v12 = vsub.f32 %v52_v0, %v70_v10  ;;  %v76_v13 = vsub.f32 %v54_v1, %v72_v11 }
  0xcb   :  { %v62_v14 = vpop.xlane.xlu0 %61  ;;  %v68_v15 = vpop.xlane.xlu1 %67 }
  0xcc   :  { %v71_v16 = vmul.f32 0.03125, %v62_v14  ;;  %v73_v17 = vmul.f32 0.03125, %v68_v15  ;;  %v78_v18 = vmul.f32 %v74_v12, %v74_v12  ;;  %v80_v19 = vmul.f32 %v76_v13, %v76_v13 }
  0xce   :  { %v75_v20 = vsub.f32 %v53_v2, %v71_v16  ;;  %v77_v21 = vsub.f32 %v55_v5, %v73_v17  ;;  %v82_v22 = vsel %vm56_vm0, %v78_v18, 0.0  ;;  %v88_v23 = vsel %vm56_vm0, %v80_v19, 0.0 }
  0xcf   :  { %83 = vadd.xlane.f32.xlu0 %v82_v22 }
  0xd0   :  { %v79_v24 = vmul.f32 %v75_v20, %v75_v20  ;;  %v81_v25 = vmul.f32 %v77_v21, %v77_v21 }
  0xd2   :  { %v85_v26 = vsel %vm56_vm0, %v79_v24, 0.0  ;;  %v91_v27 = vsel %vm56_vm0, %v81_v25, 0.0 }
  0xd3   :  { %89 = vadd.xlane.f32.xlu0 %v88_v23  ;;  %86 = vadd.xlane.f32.xlu1 %v85_v26 }
  0xd7   :  { %92 = vadd.xlane.f32.xlu1 %v91_v27 }
 0x15c   :  { %v84_v28 = vpop.xlane.xlu0 %83 }
 0x15d   :  { %v94_v29 = vmul.f32 0.03125, %v84_v28 }
 0x15f   :  { %v98_v30 = vadd.f32 1e-05, %v94_v29 }
 0x160   :  { %v87_v31 = vpop.xlane.xlu1 %86  ;;  %v90_v32 = vpop.xlane.xlu0 %89 }
 0x161   :  { %189 = vrsqrt.f32 %v98_v30  ;;  %v95_v33 = vmul.f32 0.03125, %v87_v31  ;;  %v96_v34 = vmul.f32 0.03125, %v90_v32 }
 0x163   :  { %v99_v35 = vadd.f32 1e-05, %v95_v33  ;;  %v100_v36 = vadd.f32 1e-05, %v96_v34 }
 0x164   :  { %v93_v37 = vpop.xlane.xlu1 %92 }
 0x165   :  { %191 = vrsqrt.f32 %v99_v35  ;;  %v97_v38 = vmul.f32 0.03125, %v93_v37 }
 0x166   :  { %193 = vrsqrt.f32 %v100_v36 }
 0x167   :  { %v101_v39 = vadd.f32 1e-05, %v97_v38 }
 0x169   :  { %195 = vrsqrt.f32 %v101_v39 }
 0x16b   :  { %v190_v40 = vpop.eup %189 }
 0x16c   :  { %v106_v42 = vmul.f32 %v190_v40, %v74_v12 }
 0x16e   :  { %v117_v44 = vmul.f32 %v171_v41, %v106_v42 }
 0x16f   :  { %v192_v45 = vpop.eup %191 }
 0x170   :  { %v194_v46 = vpop.eup %193  ;;  %v128_v47 = vadd.f32 %v172_v43, %v117_v44  ;;  %v107_v48 = vmul.f32 %v192_v45, %v75_v20 }
 0x171   :  { %v108_v49 = vmul.f32 %v194_v46, %v76_v13 }
 0x172   :  { %v177_v50 = vpack.c.bf16 %v128_v47, %v128_v47  ;;  %v118_v51 = vmul.f32 %v171_v41, %v107_v48 }
 0x173   :  { %v196_v52 = vpop.eup %195  ;;  %v119_v53 = vmul.f32 %v171_v41, %v108_v49 }
 0x174   :  { %v129_v54 = vadd.f32 %v172_v43, %v118_v51  ;;  %v109_v55 = vmul.f32 %v196_v52, %v77_v21  ;;  %149 = vst.msk [vmem:[#allocation8] sm:$0xf] %vm148_vm1, %v177_v50 }
 0x175   :  { %v130_v56 = vadd.f32 %v172_v43, %v119_v53 }
 0x176   :  { %v178_v57 = vpack.c.bf16 %v129_v54, %v129_v54  ;;  %v120_v58 = vmul.f32 %v171_v41, %v109_v55 }
 0x177   :  { %v179_v59 = vpack.c.bf16 %v130_v56, %v130_v56 }
 0x178   :  { %v131_v60 = vadd.f32 %v172_v43, %v120_v58  ;;  %150 = vst.msk [vmem:[#allocation8 + $0x4] sm:$0xf] %vm148_vm1, %v178_v57 }
 0x179   :  { %151 = vst.msk [vmem:[#allocation8 + $0x8] sm:$0xf] %vm148_vm1, %v179_v59 }
 0x17a   :  { %v180_v61 = vpack.c.bf16 %v131_v60, %v131_v60 }
 0x17c   :  { %152 = vst.msk [vmem:[#allocation8 + $0xc] sm:$0xf] %vm148_vm1, %v180_v61 }
 0x17d   :  { %274 = shalt.err (!%p271_p0)
}
 0x17e   :  { %s275_s27 = scalar_lea.hbm %s389_s3, 256 }
 0x17f   :  { %p276_p1 = scmp.ne.s32.totalorder %s389_s3, %s275_s27  ;;  %p279_p2 = scmp.lt.u32.totalorder %s275_s27, %s389_s3 }
 0x181   :  { %p281_p3 = pnand %p279_p2, %p276_p1 }
 0x183   :  { %284 = shalt.err (!%p281_p3)
}
 0x184   :  { %s297_s5 = smov 64   ;;  %s298_s6 = smov 4  }
 0x185   :  { %164 = dma.vmem_to_hbm [thread:$0]  %s159_s23, 256, %s389_s3, [#allocation4], %s297_s5, %s297_s5, %s298_s6  }
 0x186   :  { %289 = dma.done.wait [#allocation4], 256  }
 0x187   :  { %290 = vsyncadd [#allocation4], 4294967040 }
 0x188   :  { %168 = vsyncpa [#allocation3], 1 }
 0x189   :  { %169 = vsyncpa [#allocation6], 1 }
 0x18a   :  { %170 = vsyncpa [#allocation4], 1 }

// kernel: siamese_forward.13
= control target key start
LH: loop header
LB: loop body
LE: loop exit
PB: predicated region body
PF: predicated region fallthrough
CT: control target
= control target key end

     0   :  { %8 = vsyncpa [#allocation3], 0  ;;  %s452_s0 = inlined_call_operand.hbm [shape: bf16[32,32], index: 0, kind: input, shape index: {}]   ;;  %s453_s1 = inlined_call_operand.hbm [shape: bf16[32,64], index: 1, kind: input, shape index: {}]   ;;  %s454_s2 = inlined_call_operand.hbm [shape: f32[1,64], index: 2, kind: input, shape index: {}]   ;;  %s455_s3 = inlined_call_operand.hbm [shape: bf16[32,64], index: 3, kind: output, shape index: {}]  }
   0x1   :  { %9 = vsyncpa [#allocation6], 0 }
   0x2   :  { %10 = vsyncpa [#allocation4], 0  ;;  %s362_s12 = smov [#allocation5]   ;;  %s363_s14 = smov [#allocation2]  }
   0x3   :  { %s28_s13 = sshll.u32 %s362_s12, 4  ;;  %s16_s15 = sshll.u32 %s363_s14, 4  ;;  %s29_s13 = int_to_ptr.vmem [resolvable:$true] %s28_s13  ;;  %s388_s15 = int_to_ptr.vmem [resolvable:$true] %s16_s15 }
   0x4   :  { %s268_s18 = scalar_lea.hbm %s453_s1, 256 }
   0x5   :  { %p269_p0 = scmp.ne.s32.totalorder %s453_s1, %s268_s18  ;;  %p272_p1 = scmp.lt.u32.totalorder %s268_s18, %s453_s1 }
   0x7   :  { %p274_p2 = pnand %p272_p1, %p269_p0 }
   0x9   :  { %277 = shalt.err (!%p274_p2)
}
   0xa   :  { %s278_s23 = scalar_lea.vmem %s29_s13, 256  ;;  %p283_p4 = scmp.lt.s32.totalorder %s29_s13, %s29_s13 }
   0xb   :  { %p279_p3 = scmp.ne.s32.totalorder %s29_s13, %s278_s23  ;;  %p284_p5 = scmp.lt.s32.totalorder %s278_s23, %s278_s23 }
   0xd   :  { %p285_p6 = por %p284_p5, %p283_p4 }
   0xf   :  { %p286_p7 = pnand %p285_p6, %p279_p3 }
  0x11   :  { %289 = shalt.err (!%p286_p7)
}
  0x12   :  { %s364_s24 = smov 64   ;;  %s365_s25 = smov 4  }
  0x13   :  { %34 = dma.hbm_to_vmem [thread:$0]  %s453_s1, 256, %s29_s13, [#allocation6], %s364_s24, %s364_s24, %s365_s25  }
  0x14   :  { %s290_s30 = scalar_lea.hbm %s452_s0, 256 }
  0x15   :  { %p291_p8 = scmp.ne.s32.totalorder %s452_s0, %s290_s30  ;;  %p294_p9 = scmp.lt.u32.totalorder %s290_s30, %s452_s0 }
  0x17   :  { %p296_p10 = pnand %p294_p9, %p291_p8 }
  0x19   :  { %299 = shalt.err (!%p296_p10)
}
  0x1a   :  { %s300_s8 = scalar_lea.vmem %s388_s15, 256  ;;  %p305_p12 = scmp.lt.s32.totalorder %s388_s15, %s388_s15 }
  0x1b   :  { %p301_p11 = scmp.ne.s32.totalorder %s388_s15, %s300_s8  ;;  %p306_p13 = scmp.lt.s32.totalorder %s300_s8, %s300_s8 }
  0x1d   :  { %p307_p0 = por %p306_p13, %p305_p12 }
  0x1f   :  { %p308_p1 = pnand %p307_p0, %p301_p11 }
  0x21   :  { %311 = shalt.err (!%p308_p1)
}
  0x22   :  { %22 = dma.hbm_to_vmem [thread:$0]  %s452_s0, 256, %s388_s15, [#allocation3], %s364_s24, %s364_s24, %s365_s25  }
  0x23   :  { %s366_s10 = smov [#allocation7]   ;;  %s312_s14 = scalar_lea.hbm %s454_s2, 16 }
  0x24   :  { %s41_s11 = sshll.u32 %s366_s10, 4  ;;  %p313_p2 = scmp.ne.s32.totalorder %s454_s2, %s312_s14  ;;  %s42_s11 = int_to_ptr.vmem [resolvable:$true] %s41_s11 }
  0x25   :  { %p316_p3 = scmp.lt.u32.totalorder %s312_s14, %s454_s2 }
  0x27   :  { %p318_p4 = pnand %p316_p3, %p313_p2 }
  0x29   :  { %321 = shalt.err (!%p318_p4)
}
  0x2a   :  { %s322_s20 = scalar_lea.vmem %s42_s11, 16  ;;  %s326_s0 = scalar_lea.vmem %s42_s11, 32 }
  0x2b   :  { %p323_p5 = scmp.ne.s32.totalorder %s42_s11, %s322_s20  ;;  %p327_p6 = scmp.lt.s32.totalorder %s42_s11, %s42_s11 }
  0x2c   :  { %p328_p7 = scmp.lt.s32.totalorder %s326_s0, %s322_s20 }
  0x2e   :  { %p329_p8 = por %p328_p7, %p327_p6 }
  0x30   :  { %p330_p9 = pnand %p329_p8, %p323_p5 }
  0x32   :  { %333 = shalt.err (!%p330_p9)
}
  0x33   :  { %44 = dma.hbm_to_vmem [thread:$0]  %s454_s2, 16, %s42_s11, [#allocation6]  }
  0x34   :  { %356 = dma.done.wait [#allocation3], 256  }
  0x35   :  { %357 = vsyncadd [#allocation3], 4294967040 }
  0x36   :  { %358 = dma.done.wait [#allocation6], 272  }
  0x37   :  { %359 = vsyncadd [#allocation6], 4294967024  ;;  %v256_v0 = vld [vmem:[#allocation5] sm:$0xff]   ;;  %v257_v1 = vld [vmem:[#allocation5 + $0x8] sm:$0xff]   ;;  %vm92_vm0 = vcmask 261120   ;;  %vm200_vm1 = vcmask 519168  }
  0x38   :  { %242 = vmatprep.subr.bf16.mxu0 %v256_v0  ;;  %v258_v2 = vld [vmem:[#allocation2] sm:$0xff]   ;;  %v259_v3 = vld [vmem:[#allocation2 + $0x8] sm:$0xff]   ;;  %s367_s2 = smov [#allocation8]  }
  0x39   :  { %243 = vmatpush3.bf16.msra.mxu0 %v256_v0  ;;  %246 = vmatprep.mubr.msk.bf16.mxu0 %vm92_vm0, %v258_v2  ;;  %v223_v4 = vld [vmem:[#allocation7] ss:$0 sm:$0xff]  ;;  %s210_s22 = sshll.u32 %s367_s2, 4  ;;  %s211_s22 = int_to_ptr.vmem [resolvable:$true] %s210_s22 }
  0x3a   :  { %244 = vmatprep.subr.bf16.mxu0 %v257_v1  ;;  %s334_s23 = scalar_lea.vmem %s211_s22, 256  ;;  %p339_p11 = scmp.lt.s32.totalorder %s211_s22, %s211_s22 }
  0x3b   :  { %p335_p10 = scmp.ne.s32.totalorder %s211_s22, %s334_s23  ;;  %p340_p12 = scmp.lt.s32.totalorder %s334_s23, %s334_s23 }
  0x3d   :  { %245 = vmatpush3.bf16.msra.mxu0 %v257_v1  ;;  %p341_p13 = por %p340_p12, %p339_p11 }
  0x3f   :  { %p342_p0 = pnand %p341_p13, %p335_p10 }
  0x40   :  { %247 = vmatmul.mubr.msk.bf16.vlgmr.msra.gmra.mrb[0].mxu0 %vm92_vm0, %v259_v3 }
 0x113   :  { %v248_v5 = vpop.f32.mrb[0].mxu0 }
 0x114   :  { %v142_v6 = vadd.f32 %v248_v5, %v223_v4  ;;  %v133_v7 = vpop.f32.mrb[1].mxu0 }
 0x115   :  { %v134_v8 = vadd.f32 %v223_v4, %v133_v7  ;;  %v249_v9 = vpop.f32.mrb[2].mxu0 }
 0x116   :  { %v150_v10 = vmul.f32 %v142_v6, %v142_v6  ;;  %v145_v11 = vadd.f32 %v249_v9, %v223_v4  ;;  %v136_v12 = vpop.f32.mrb[3].mxu0 }
 0x117   :  { %v148_v13 = vmul.f32 %v134_v8, %v134_v8  ;;  %v137_v14 = vadd.f32 %v223_v4, %v136_v12 }
 0x118   :  { %v154_v15 = vmul.f32 %v150_v10, %v142_v6  ;;  %v151_v16 = vmul.f32 %v145_v11, %v145_v11 }
 0x119   :  { %v152_v17 = vmul.f32 %v148_v13, %v134_v8  ;;  %v149_v18 = vmul.f32 %v137_v14, %v137_v14 }
 0x11a   :  { %v158_v19 = vmul.f32 0.044715, %v154_v15  ;;  %v155_v20 = vmul.f32 %v151_v16, %v145_v11 }
 0x11b   :  { %v156_v21 = vmul.f32 0.044715, %v152_v17  ;;  %v153_v22 = vmul.f32 %v149_v18, %v137_v14 }
 0x11c   :  { %v162_v23 = vadd.f32 %v158_v19, %v142_v6  ;;  %v159_v24 = vmul.f32 0.044715, %v155_v20 }
 0x11d   :  { %v160_v25 = vadd.f32 %v156_v21, %v134_v8  ;;  %v157_v26 = vmul.f32 0.044715, %v153_v22 }
 0x11e   :  { %v166_v27 = vmul.f32 0.7978846, %v162_v23  ;;  %v163_v28 = vadd.f32 %v159_v24, %v145_v11 }
 0x11f   :  { %v164_v29 = vmul.f32 0.7978846, %v160_v25  ;;  %v161_v30 = vadd.f32 %v157_v26, %v137_v14 }
 0x120   :  { %260 = vtanh.f32 %v166_v27  ;;  %v167_v31 = vmul.f32 0.7978846, %v163_v28 }
 0x121   :  { %262 = vtanh.f32 %v164_v29  ;;  %v165_v32 = vmul.f32 0.7978846, %v161_v30 }
 0x122   :  { %264 = vtanh.f32 %v167_v31 }
 0x123   :  { %266 = vtanh.f32 %v165_v32 }
 0x12a   :  { %v261_v33 = vpop.eup %260 }
 0x12b   :  { %v263_v34 = vpop.eup %262  ;;  %v174_v35 = vadd.f32 1.0, %v261_v33 }
 0x12c   :  { %v265_v36 = vpop.eup %264  ;;  %v172_v37 = vadd.f32 1.0, %v263_v34 }
 0x12d   :  { %v267_v38 = vpop.eup %266  ;;  %v178_v39 = vmul.f32 0.5, %v174_v35  ;;  %v175_v40 = vadd.f32 1.0, %v265_v36 }
 0x12e   :  { %v176_v41 = vmul.f32 0.5, %v172_v37  ;;  %v173_v42 = vadd.f32 1.0, %v267_v38 }
 0x12f   :  { %v182_v43 = vmul.f32 %v178_v39, %v142_v6  ;;  %v179_v44 = vmul.f32 0.5, %v175_v40 }
 0x130   :  { %v180_v45 = vmul.f32 %v176_v41, %v134_v8  ;;  %v177_v46 = vmul.f32 0.5, %v173_v42 }
 0x131   :  { %v236_v47 = vpack.c.bf16 %v182_v43, %v182_v43  ;;  %v183_v48 = vmul.f32 %v179_v44, %v145_v11 }
 0x132   :  { %v234_v49 = vpack.c.bf16 %v180_v45, %v180_v45  ;;  %v181_v50 = vmul.f32 %v177_v46, %v137_v14 }
 0x133   :  { %v237_v51 = vpack.c.bf16 %v183_v48, %v183_v48  ;;  %203 = vst.msk [vmem:[#allocation8 + $0x8] sm:$0xf] %vm200_vm1, %v236_v47 }
 0x134   :  { %v235_v52 = vpack.c.bf16 %v181_v50, %v181_v50  ;;  %201 = vst.msk [vmem:[#allocation8] sm:$0xf] %vm200_vm1, %v234_v49 }
 0x135   :  { %204 = vst.msk [vmem:[#allocation8 + $0xc] sm:$0xf] %vm200_vm1, %v237_v51 }
 0x136   :  { %202 = vst.msk [vmem:[#allocation8 + $0x4] sm:$0xf] %vm200_vm1, %v235_v52 }
 0x137   :  { %345 = shalt.err (!%p342_p0)
}
 0x138   :  { %s346_s28 = scalar_lea.hbm %s455_s3, 256 }
 0x139   :  { %p347_p1 = scmp.ne.s32.totalorder %s455_s3, %s346_s28  ;;  %p350_p2 = scmp.lt.u32.totalorder %s346_s28, %s455_s3 }
 0x13b   :  { %p352_p3 = pnand %p350_p2, %p347_p1 }
 0x13d   :  { %355 = shalt.err (!%p352_p3)
}
 0x13e   :  { %216 = dma.vmem_to_hbm [thread:$0]  %s211_s22, 256, %s455_s3, [#allocation4], %s364_s24, %s364_s24, %s365_s25  }
 0x13f   :  { %360 = dma.done.wait [#allocation4], 256  }
 0x140   :  { %361 = vsyncadd [#allocation4], 4294967040 }
 0x141   :  { %220 = vsyncpa [#allocation3], 1 }
 0x142   :  { %221 = vsyncpa [#allocation6], 1 }
 0x143   :  { %222 = vsyncpa [#allocation4], 1 }

// kernel: siamese_forward.12
= control target key start
LH: loop header
LB: loop body
LE: loop exit
PB: predicated region body
PF: predicated region fallthrough
CT: control target
= control target key end

     0   :  { %11 = vsyncpa [#allocation4], 0  ;;  %s748_s0 = inlined_call_operand.hbm [shape: bf16[32,32], index: 0, kind: input, shape index: {}]   ;;  %s749_s1 = inlined_call_operand.hbm [shape: bf16[32,32], index: 1, kind: input, shape index: {}]   ;;  %s750_s2 = inlined_call_operand.hbm [shape: f32[1,32], index: 2, kind: input, shape index: {}]   ;;  %s751_s3 = inlined_call_operand.hbm [shape: bf16[32,32], index: 3, kind: input, shape index: {}]   ;;  %s752_s4 = inlined_call_operand.hbm [shape: f32[1,32], index: 4, kind: input, shape index: {}]   ;;  %s753_s5 = inlined_call_operand.hbm [shape: f32[1,32], index: 5, kind: input, shape index: {}]   ;;  %s754_s6 = inlined_call_operand.hbm [shape: bf16[32,32], index: 6, kind: output, shape index: {}]  }
   0x1   :  { %12 = vsyncpa [#allocation7], 0 }
   0x2   :  { %13 = vsyncpa [#allocation10], 0 }
   0x3   :  { %14 = vsyncpa [#allocation13], 0 }
   0x4   :  { %15 = vsyncpa [#allocation5], 0  ;;  %s578_s21 = smov [#allocation6]   ;;  %s579_s23 = smov [#allocation9]  }
   0x5   :  { %s33_s22 = sshll.u32 %s578_s21, 4  ;;  %s55_s24 = sshll.u32 %s579_s23, 4  ;;  %s34_s22 = int_to_ptr.vmem [resolvable:$true] %s33_s22  ;;  %s623_s24 = int_to_ptr.vmem [resolvable:$true] %s55_s24 }
   0x6   :  { %s414_s27 = scalar_lea.hbm %s749_s1, 256 }
   0x7   :  { %p415_p0 = scmp.ne.s32.totalorder %s749_s1, %s414_s27  ;;  %p418_p1 = scmp.lt.u32.totalorder %s414_s27, %s749_s1 }
   0x9   :  { %p420_p2 = pnand %p418_p1, %p415_p0 }
   0xb   :  { %423 = shalt.err (!%p420_p2)
}
   0xc   :  { %s424_s8 = scalar_lea.vmem %s34_s22, 256  ;;  %p429_p4 = scmp.lt.s32.totalorder %s34_s22, %s34_s22 }
   0xd   :  { %p425_p3 = scmp.ne.s32.totalorder %s34_s22, %s424_s8  ;;  %p430_p5 = scmp.lt.s32.totalorder %s424_s8, %s424_s8 }
   0xf   :  { %p431_p6 = por %p430_p5, %p429_p4 }
  0x11   :  { %p432_p7 = pnand %p431_p6, %p425_p3 }
  0x13   :  { %435 = shalt.err (!%p432_p7)
}
  0x14   :  { %s580_s9 = smov 64   ;;  %s581_s10 = smov 4  }
  0x15   :  { %39 = dma.hbm_to_vmem [thread:$0]  %s749_s1, 256, %s34_s22, [#allocation7], %s580_s9, %s580_s9, %s581_s10  }
  0x16   :  { %s436_s15 = scalar_lea.hbm %s751_s3, 256 }
  0x17   :  { %p437_p8 = scmp.ne.s32.totalorder %s751_s3, %s436_s15  ;;  %p440_p9 = scmp.lt.u32.totalorder %s436_s15, %s751_s3 }
  0x19   :  { %p442_p10 = pnand %p440_p9, %p437_p8 }
  0x1b   :  { %445 = shalt.err (!%p442_p10)
}
  0x1c   :  { %s446_s20 = scalar_lea.vmem %s623_s24, 256  ;;  %p451_p12 = scmp.lt.s32.totalorder %s623_s24, %s623_s24 }
  0x1d   :  { %p447_p11 = scmp.ne.s32.totalorder %s623_s24, %s446_s20  ;;  %p452_p13 = scmp.lt.s32.totalorder %s446_s20, %s446_s20 }
  0x1f   :  { %p453_p0 = por %p452_p13, %p451_p12 }
  0x21   :  { %p454_p1 = pnand %p453_p0, %p447_p11 }
  0x23   :  { %457 = shalt.err (!%p454_p1)
}
  0x24   :  { %61 = dma.hbm_to_vmem [thread:$0]  %s751_s3, 256, %s623_s24, [#allocation10], %s580_s9, %s580_s9, %s581_s10  }
  0x25   :  { %s582_s22 = smov [#allocation3]   ;;  %s583_s25 = smov [#allocation8]  }
  0x26   :  { %s21_s23 = sshll.u32 %s582_s22, 4  ;;  %s46_s26 = sshll.u32 %s583_s25, 4  ;;  %s22_s23 = int_to_ptr.vmem [resolvable:$true] %s21_s23  ;;  %s47_s26 = int_to_ptr.vmem [resolvable:$true] %s46_s26 }
  0x27   :  { %s458_s29 = scalar_lea.hbm %s748_s0, 256 }
  0x28   :  { %p459_p2 = scmp.ne.s32.totalorder %s748_s0, %s458_s29  ;;  %p462_p3 = scmp.lt.u32.totalorder %s458_s29, %s748_s0 }
  0x2a   :  { %p464_p4 = pnand %p462_p3, %p459_p2 }
  0x2c   :  { %467 = shalt.err (!%p464_p4)
}
  0x2d   :  { %s468_s3 = scalar_lea.vmem %s22_s23, 256  ;;  %p473_p6 = scmp.lt.s32.totalorder %s22_s23, %s22_s23 }
  0x2e   :  { %p469_p5 = scmp.ne.s32.totalorder %s22_s23, %s468_s3  ;;  %p474_p7 = scmp.lt.s32.totalorder %s468_s3, %s468_s3 }
  0x30   :  { %p475_p8 = por %p474_p7, %p473_p6 }
  0x32   :  { %p476_p9 = pnand %p475_p8, %p469_p5 }
  0x34   :  { %479 = shalt.err (!%p476_p9)
}
  0x35   :  { %27 = dma.hbm_to_vmem [thread:$0]  %s748_s0, 256, %s22_s23, [#allocation4], %s580_s9, %s580_s9, %s581_s10  }
  0x36   :  { %s480_s15 = scalar_lea.hbm %s750_s2, 16 }
  0x37   :  { %p481_p10 = scmp.ne.s32.totalorder %s750_s2, %s480_s15  ;;  %p484_p11 = scmp.lt.u32.totalorder %s480_s15, %s750_s2 }
  0x39   :  { %p486_p12 = pnand %p484_p11, %p481_p10 }
  0x3b   :  { %489 = shalt.err (!%p486_p12)
}
  0x3c   :  { %s490_s20 = scalar_lea.vmem %s47_s26, 16  ;;  %s494_s1 = scalar_lea.vmem %s47_s26, 32 }
  0x3d   :  { %p491_p13 = scmp.ne.s32.totalorder %s47_s26, %s490_s20  ;;  %p495_p0 = scmp.lt.s32.totalorder %s47_s26, %s47_s26 }
  0x3e   :  { %p496_p1 = scmp.lt.s32.totalorder %s494_s1, %s490_s20 }
  0x40   :  { %p497_p2 = por %p496_p1, %p495_p0 }
  0x42   :  { %p498_p3 = pnand %p497_p2, %p491_p13 }
  0x44   :  { %501 = shalt.err (!%p498_p3)
}
  0x45   :  { %49 = dma.hbm_to_vmem [thread:$0]  %s750_s2, 16, %s47_s26, [#allocation7]  }
  0x46   :  { %s584_s22 = smov [#allocation11]   ;;  %s585_s25 = smov [#allocation12]  }
  0x47   :  { %s68_s23 = sshll.u32 %s584_s22, 4  ;;  %s78_s27 = sshll.u32 %s585_s25, 4  ;;  %s69_s23 = int_to_ptr.vmem [resolvable:$true] %s68_s23  ;;  %s79_s27 = int_to_ptr.vmem [resolvable:$true] %s78_s27 }
  0x48   :  { %s502_s30 = scalar_lea.hbm %s752_s4, 16 }
  0x49   :  { %p503_p4 = scmp.ne.s32.totalorder %s752_s4, %s502_s30  ;;  %p506_p5 = scmp.lt.u32.totalorder %s502_s30, %s752_s4 }
  0x4b   :  { %p508_p6 = pnand %p506_p5, %p503_p4 }
  0x4d   :  { %511 = shalt.err (!%p508_p6)
}
  0x4e   :  { %s512_s2 = scalar_lea.vmem %s69_s23, 16  ;;  %s516_s26 = scalar_lea.vmem %s69_s23, 32 }
  0x4f   :  { %p513_p7 = scmp.ne.s32.totalorder %s69_s23, %s512_s2  ;;  %p517_p8 = scmp.lt.s32.totalorder %s69_s23, %s69_s23 }
  0x50   :  { %p518_p9 = scmp.lt.s32.totalorder %s516_s26, %s512_s2 }
  0x52   :  { %p519_p10 = por %p518_p9, %p517_p8 }
  0x54   :  { %p520_p11 = pnand %p519_p10, %p513_p7 }
  0x56   :  { %523 = shalt.err (!%p520_p11)
}
  0x57   :  { %71 = dma.hbm_to_vmem [thread:$0]  %s752_s4, 16, %s69_s23, [#allocation10]  }
  0x58   :  { %s524_s15 = scalar_lea.hbm %s753_s5, 16 }
  0x59   :  { %p525_p12 = scmp.ne.s32.totalorder %s753_s5, %s524_s15  ;;  %p528_p13 = scmp.lt.u32.totalorder %s524_s15, %s753_s5 }
  0x5b   :  { %p530_p0 = pnand %p528_p13, %p525_p12 }
  0x5d   :  { %533 = shalt.err (!%p530_p0)
}
  0x5e   :  { %s534_s20 = scalar_lea.vmem %s79_s27, 16  ;;  %s538_s1 = scalar_lea.vmem %s79_s27, 32 }
  0x5f   :  { %p535_p1 = scmp.ne.s32.totalorder %s79_s27, %s534_s20  ;;  %p539_p2 = scmp.lt.s32.totalorder %s79_s27, %s79_s27 }
  0x60   :  { %p540_p3 = scmp.lt.s32.totalorder %s538_s1, %s534_s20 }
  0x62   :  { %p541_p4 = por %p540_p3, %p539_p2 }
  0x64   :  { %p542_p5 = pnand %p541_p4, %p535_p1 }
  0x66   :  { %545 = shalt.err (!%p542_p5)
}
  0x67   :  { %81 = dma.hbm_to_vmem [thread:$0]  %s753_s5, 16, %s79_s27, [#allocation13]  }
  0x68   :  { %568 = dma.done.wait [#allocation4], 256  }
  0x69   :  { %569 = vsyncadd [#allocation4], 4294967040 }
  0x6a   :  { %570 = dma.done.wait [#allocation7], 272  }
  0x6b   :  { %571 = vsyncadd [#allocation7], 4294967024 }
  0x6c   :  { %572 = dma.done.wait [#allocation10], 272  }
  0x6d   :  { %573 = vsyncadd [#allocation10], 4294967024 }
  0x6e   :  { %574 = dma.done.wait [#allocation13], 16  }
  0x6f   :  { %575 = vsyncadd [#allocation13], 4294967280  ;;  %vm105_vm0 = vcmask 261120   ;;  %v586_v0 = vmov 0.0   ;;  %v402_v1 = vld [vmem:[#allocation6] sm:$0xff]   ;;  %v403_v2 = vld [vmem:[#allocation6 + $0x8] sm:$0xff]  }
  0x70   :  { %108 = vst.msk [vmem:[#allocation2 + $0x10] sm:$0xff] %vm105_vm0, %v586_v0  ;;  %106 = vst.msk [vmem:[#allocation2] sm:$0xff] %vm105_vm0, %v586_v0  ;;  %384 = vmatprep.subr.bf16.mxu0 %v402_v1  ;;  %v404_v3 = vld [vmem:[#allocation3] sm:$0xff]   ;;  %v405_v4 = vld [vmem:[#allocation3 + $0x8] sm:$0xff]   ;;  %vm329_vm1 = vcmask 257024   ;;  %s587_s5 = smov [#allocation14]  }
  0x71   :  { %107 = vst.msk [vmem:[#allocation2 + $0x8] sm:$0xff] %vm105_vm0, %v586_v0  ;;  %109 = vst.msk [vmem:[#allocation2 + $0x18] sm:$0xff] %vm105_vm0, %v586_v0  ;;  %385 = vmatpush3.bf16.msra.mxu0 %v402_v1  ;;  %388 = vmatprep.mubr.msk.bf16.mxu0 %vm105_vm0, %v404_v3  ;;  %v379_v17 = vld [vmem:[#allocation9 + $0x8] sm:$0xff]   ;;  %v372_v18 = vld [vmem:[#allocation9] sm:$0xff]   ;;  %s339_s21 = sshll.u32 %s587_s5, 4  ;;  %s340_s21 = int_to_ptr.vmem [resolvable:$true] %s339_s21 }
  0x72   :  { %386 = vmatprep.subr.bf16.mxu0 %v403_v2  ;;  %v360_v19 = vld [vmem:[#allocation8] ss:$0 sm:$0xff]  ;;  %v377_v20 = vunpack.c.l.bf16 %v379_v17  ;;  %v373_v22 = vunpack.c.l.bf16 %v372_v18  ;;  %v378_v25 = vunpack.c.h.bf16 %v379_v17  ;;  %v374_v28 = vunpack.c.h.bf16 %v372_v18  ;;  %s546_s22 = scalar_lea.vmem %s340_s21, 256  ;;  %p551_p7 = scmp.lt.s32.totalorder %s340_s21, %s340_s21 }
  0x73   :  { %p547_p6 = scmp.ne.s32.totalorder %s340_s21, %s546_s22  ;;  %p552_p8 = scmp.lt.s32.totalorder %s546_s22, %s546_s22 }
  0x75   :  { %387 = vmatpush3.bf16.msra.mxu0 %v403_v2  ;;  %p553_p9 = por %p552_p8, %p551_p7 }
  0x77   :  { %v112_v5 = vld [vmem:[#allocation2 + $0x10] sm:$0xff]  ;;  %v110_v6 = vld [vmem:[#allocation2] sm:$0xff]  ;;  %p554_p10 = pnand %p553_p9, %p547_p6 }
  0x78   :  { %389 = vmatmul.mubr.msk.bf16.vlgmr.msra.gmra.mrb[0].mxu0 %vm105_vm0, %v405_v4  ;;  %v113_v8 = vld [vmem:[#allocation2 + $0x18] sm:$0xff]  ;;  %v111_v11 = vld [vmem:[#allocation2 + $0x8] sm:$0xff] }
 0x14b   :  { %v390_v7 = vpop.f32.mrb[0].mxu0 }
 0x14c   :  { %v202_v9 = vadd.f32 %v390_v7, %v112_v5  ;;  %v185_v10 = vpop.f32.mrb[1].mxu0 }
 0x14d   :  { %v200_v12 = vadd.f32 %v185_v10, %v110_v6  ;;  %v391_v13 = vpop.f32.mrb[2].mxu0 }
 0x14e   :  { %206 = vst.msk [vmem:[#allocation2 + $0x10] sm:$0xff] %vm105_vm0, %v202_v9  ;;  %v203_v14 = vadd.f32 %v391_v13, %v113_v8  ;;  %v188_v15 = vpop.f32.mrb[3].mxu0  ;;  %v361_v9 = vld [vmem:[#allocation11] ss:$0 sm:$0xff] }
 0x14f   :  { %204 = vst.msk [vmem:[#allocation2] sm:$0xff] %vm105_vm0, %v200_v12  ;;  %v201_v16 = vadd.f32 %v188_v15, %v111_v11  ;;  %v362_v11 = vld [vmem:[#allocation12] ss:$0 sm:$0xff] }
 0x150   :  { %207 = vst.msk [vmem:[#allocation2 + $0x18] sm:$0xff] %vm105_vm0, %v203_v14 }
 0x151   :  { %205 = vst.msk [vmem:[#allocation2 + $0x8] sm:$0xff] %vm105_vm0, %v201_v16 }
 0x155   :  { %v213_v21 = vld [vmem:[#allocation2 + $0x10] sm:$0xff] }
 0x156   :  { %v224_v23 = vadd.f32 %v360_v19, %v213_v21  ;;  %v211_v24 = vld [vmem:[#allocation2] sm:$0xff] }
 0x157   :  { %v222_v26 = vadd.f32 %v360_v19, %v211_v24  ;;  %v214_v27 = vld [vmem:[#allocation2 + $0x18] sm:$0xff] }
 0x158   :  { %v236_v29 = vadd.f32 %v377_v20, %v224_v23  ;;  %v225_v30 = vadd.f32 %v360_v19, %v214_v27  ;;  %v212_v31 = vld [vmem:[#allocation2 + $0x8] sm:$0xff] }
 0x159   :  { %v234_v32 = vadd.f32 %v373_v22, %v222_v26  ;;  %v223_v33 = vadd.f32 %v360_v19, %v212_v31 }
 0x15a   :  { %v244_v34 = vsel %vm105_vm0, %v236_v29, 0.0  ;;  %v237_v35 = vadd.f32 %v378_v25, %v225_v30 }
 0x15b   :  { %245 = vadd.xlane.f32.xlu1 %v244_v34  ;;  %v238_v36 = vsel %vm105_vm0, %v234_v32, 0.0  ;;  %v235_v37 = vadd.f32 %v374_v28, %v223_v33 }
 0x15c   :  { %239 = vadd.xlane.f32.xlu0 %v238_v36  ;;  %v247_v38 = vsel %vm105_vm0, %v237_v35, 0.0 }
 0x15d   :  { %v241_v39 = vsel %vm105_vm0, %v235_v37, 0.0 }
 0x15f   :  { %248 = vadd.xlane.f32.xlu1 %v247_v38 }
 0x160   :  { %242 = vadd.xlane.f32.xlu0 %v241_v39 }
 0x1e8   :  { %v246_v40 = vpop.xlane.xlu1 %245 }
 0x1e9   :  { %v253_v41 = vmul.f32 0.03125, %v246_v40  ;;  %v240_v42 = vpop.xlane.xlu0 %239 }
 0x1ea   :  { %v251_v43 = vmul.f32 0.03125, %v240_v42 }
 0x1eb   :  { %v257_v44 = vsub.f32 %v236_v29, %v253_v41 }
 0x1ec   :  { %v255_v45 = vsub.f32 %v234_v32, %v251_v43  ;;  %v249_v46 = vpop.xlane.xlu1 %248 }
 0x1ed   :  { %v254_v47 = vmul.f32 0.03125, %v249_v46  ;;  %v243_v48 = vpop.xlane.xlu0 %242  ;;  %v261_v54 = vmul.f32 %v257_v44, %v257_v44 }
 0x1ee   :  { %v252_v49 = vmul.f32 0.03125, %v243_v48  ;;  %v259_v50 = vmul.f32 %v255_v45, %v255_v45 }
 0x1ef   :  { %v258_v51 = vsub.f32 %v237_v35, %v254_v47  ;;  %v269_v56 = vsel %vm105_vm0, %v261_v54, 0.0 }
 0x1f0   :  { %v256_v52 = vsub.f32 %v235_v37, %v252_v49  ;;  %v263_v53 = vsel %vm105_vm0, %v259_v50, 0.0 }
 0x1f1   :  { %264 = vadd.xlane.f32.xlu0 %v263_v53  ;;  %v262_v58 = vmul.f32 %v258_v51, %v258_v51 }
 0x1f2   :  { %v260_v55 = vmul.f32 %v256_v52, %v256_v52 }
 0x1f3   :  { %v272_v59 = vsel %vm105_vm0, %v262_v58, 0.0 }
 0x1f4   :  { %v266_v57 = vsel %vm105_vm0, %v260_v55, 0.0 }
 0x1f5   :  { %270 = vadd.xlane.f32.xlu0 %v269_v56  ;;  %267 = vadd.xlane.f32.xlu1 %v266_v57 }
 0x1f9   :  { %273 = vadd.xlane.f32.xlu1 %v272_v59 }
 0x27e   :  { %v265_v60 = vpop.xlane.xlu0 %264 }
 0x27f   :  { %v275_v61 = vmul.f32 0.03125, %v265_v60 }
 0x281   :  { %v279_v62 = vadd.f32 1e-05, %v275_v61 }
 0x282   :  { %v268_v63 = vpop.xlane.xlu1 %267  ;;  %v271_v0 = vpop.xlane.xlu0 %270 }
 0x283   :  { %406 = vrsqrt.f32 %v279_v62  ;;  %v276_v1 = vmul.f32 0.03125, %v268_v63  ;;  %v277_v2 = vmul.f32 0.03125, %v271_v0 }
 0x285   :  { %v280_v3 = vadd.f32 1e-05, %v276_v1  ;;  %v281_v4 = vadd.f32 1e-05, %v277_v2 }
 0x286   :  { %v274_v5 = vpop.xlane.xlu1 %273 }
 0x287   :  { %408 = vrsqrt.f32 %v280_v3  ;;  %v278_v6 = vmul.f32 0.03125, %v274_v5 }
 0x288   :  { %410 = vrsqrt.f32 %v281_v4 }
 0x289   :  { %v282_v7 = vadd.f32 1e-05, %v278_v6 }
 0x28b   :  { %412 = vrsqrt.f32 %v282_v7 }
 0x28d   :  { %v407_v8 = vpop.eup %406 }
 0x28e   :  { %v287_v10 = vmul.f32 %v407_v8, %v255_v45 }
 0x290   :  { %v298_v12 = vmul.f32 %v361_v9, %v287_v10 }
 0x291   :  { %v409_v13 = vpop.eup %408 }
 0x292   :  { %v411_v14 = vpop.eup %410  ;;  %v288_v15 = vmul.f32 %v409_v13, %v256_v52  ;;  %v309_v16 = vadd.f32 %v362_v11, %v298_v12 }
 0x293   :  { %v289_v17 = vmul.f32 %v411_v14, %v257_v44 }
 0x294   :  { %v299_v18 = vmul.f32 %v361_v9, %v288_v15  ;;  %v367_v19 = vpack.c.bf16 %v309_v16, %v309_v16 }
 0x295   :  { %v413_v20 = vpop.eup %412  ;;  %v300_v21 = vmul.f32 %v361_v9, %v289_v17 }
 0x296   :  { %v290_v22 = vmul.f32 %v413_v20, %v258_v51  ;;  %v310_v23 = vadd.f32 %v362_v11, %v299_v18  ;;  %330 = vst.msk [vmem:[#allocation14] sm:$0xf] %vm329_vm1, %v367_v19 }
 0x297   :  { %v311_v24 = vadd.f32 %v362_v11, %v300_v21 }
 0x298   :  { %v301_v25 = vmul.f32 %v361_v9, %v290_v22  ;;  %v368_v26 = vpack.c.bf16 %v310_v23, %v310_v23 }
 0x299   :  { %v369_v27 = vpack.c.bf16 %v311_v24, %v311_v24 }
 0x29a   :  { %v312_v28 = vadd.f32 %v362_v11, %v301_v25  ;;  %331 = vst.msk [vmem:[#allocation14 + $0x4] sm:$0xf] %vm329_vm1, %v368_v26 }
 0x29b   :  { %332 = vst.msk [vmem:[#allocation14 + $0x8] sm:$0xf] %vm329_vm1, %v369_v27 }
 0x29c   :  { %v370_v29 = vpack.c.bf16 %v312_v28, %v312_v28 }
 0x29e   :  { %333 = vst.msk [vmem:[#allocation14 + $0xc] sm:$0xf] %vm329_vm1, %v370_v29 }
 0x29f   :  { %557 = shalt.err (!%p554_p10)
}
 0x2a0   :  { %s558_s27 = scalar_lea.hbm %s754_s6, 256 }
 0x2a1   :  { %p559_p11 = scmp.ne.s32.totalorder %s754_s6, %s558_s27  ;;  %p562_p12 = scmp.lt.u32.totalorder %s558_s27, %s754_s6 }
 0x2a3   :  { %p564_p13 = pnand %p562_p12, %p559_p11 }
 0x2a5   :  { %567 = shalt.err (!%p564_p13)
}
 0x2a6   :  { %345 = dma.vmem_to_hbm [thread:$0]  %s340_s21, 256, %s754_s6, [#allocation5], %s580_s9, %s580_s9, %s581_s10  }
 0x2a7   :  { %576 = dma.done.wait [#allocation5], 256  }
 0x2a8   :  { %577 = vsyncadd [#allocation5], 4294967040 }
 0x2a9   :  { %349 = vsyncpa [#allocation4], 1 }
 0x2aa   :  { %350 = vsyncpa [#allocation7], 1 }
 0x2ab   :  { %351 = vsyncpa [#allocation10], 1 }
 0x2ac   :  { %352 = vsyncpa [#allocation13], 1 }
 0x2ad   :  { %353 = vsyncpa [#allocation5], 1 }

// kernel: siamese_forward.11
= control target key start
LH: loop header
LB: loop body
LE: loop exit
PB: predicated region body
PF: predicated region fallthrough
CT: control target
= control target key end

     0   :  { %9 = vsyncpa [#allocation4], 0  ;;  %s1397_s0 = inlined_call_operand.hbm [shape: bf16[4,8,32], index: 0, kind: input, shape index: {}]   ;;  %s1398_s1 = inlined_call_operand.hbm [shape: bf16[32,96], index: 1, kind: input, shape index: {}]   ;;  %s1399_s2 = inlined_call_operand.hbm [shape: f32[1,96], index: 2, kind: input, shape index: {}]   ;;  %s1400_s3 = inlined_call_operand.hbm [shape: f32[4,1,8], index: 3, kind: input, shape index: {}]   ;;  %s1401_s4 = inlined_call_operand.hbm [shape: bf16[4,8,32], index: 4, kind: output, shape index: {}]  }
   0x1   :  { %11 = vsyncpa [#allocation4 + $0x1], 0 }
   0x2   :  { %12 = vsyncpa [#allocation7], 0 }
   0x3   :  { %13 = vsyncpa [#allocation10], 0 }
   0x4   :  { %15 = vsyncpa [#allocation10 + $0x1], 0 }
   0x5   :  { %16 = vsyncpa [#allocation5], 0 }
   0x6   :  { %18 = vsyncpa [#allocation5 + $0x1], 0  ;;  %s1104_s15 = smov 0   ;;  %s1106_s16 = smov 0  }
   0x7   :  { %s1108_s17 = smov 0   ;;  %s1110_s18 = smov 0  }
   0x8 LB: > { %s1125_s19 = sadd.s32 4294967295, %s1061_s18   ;;  %s710_s20 = sadd.s32 4294967294, %s1061_s18   ;;  %s1061_s18 = sphi %s1110_s18, %s1422_s18   ;;  %s1057_s17 = sphi %s1108_s17, %s1421_s17   ;;  %s1053_s16 = sphi %s1106_s16, %s1420_s16   ;;  %s1049_s15 = sphi %s1104_s15, %s1419_s15  }
   0x9   : > { %p44_p0 = scmp.ne.s32.totalorder %s1053_s16, %s1049_s15  ;;  %p1402_p1 = scmp.eq.s32.totalorder %s1125_s19, 0 }
   0xa   : > { %p142_p3 = scmp.eq.s32.totalorder %s710_s20, 3  ;;  %p711_p5 = scmp.ge.s32.totalorder %s1061_s18, 1 }
   0xb   : > { %p1134_p4 = por %p1402_p1, %p44_p0  ;;  %p149_p7 = scmp.lt.s32.totalorder %s1061_s18, 5 }
   0xc   : > { %p1139_p6 = por %p142_p3, %p44_p0  ;;  %s1063_s24 = smov [#allocation6]  }
   0xd   : > { %s1406_s21 = scalar_select %p1134_p4, 1, 0 }
   0xe   : > { %s1407_s22 = scalar_select %p1139_p6, 1, 0 }
   0xf   : > { %p1144_p8 = pnand %p711_p5, %p149_p7  ;;  %s161_s25 = sshll.u32 %s1063_s24, 4  ;;  %s162_s25 = int_to_ptr.vmem [resolvable:$true] %s161_s25 }
  0x10   : > { %s1064_s27 = smov [#allocation8]   ;;  %s871_s5 = scalar_lea.hbm %s1398_s1, 256 }
  0x11   : > { %s1408_s23 = scalar_select %p1144_p8, 1, 0 }
  0x12   : > { %p792_p9 = pneg %p1144_p8  ;;  %s175_s28 = sshll.u32 %s1064_s27, 4  ;;  %s1156_s28 = int_to_ptr.vmem [resolvable:$true] %s175_s28 }
  0x13   : > { %p872_p11 = scmp.ne.s32.totalorder %s1398_s1, %s871_s5  ;;  %p878_p3 = scmp.lt.u32.totalorder %s871_s5, %s1398_s1 }
  0x14   : > { %p1152_p10 = pnand %p792_p9, %p1402_p1 }
  0x16   : > { %p873_p12 = pneg %p1152_p10 }
  0x18   : > { %p874_p13 = pnand %p873_p12, %p872_p11 }
  0x1a   : > { %p875_p0 = pneg %p874_p13 }
  0x1c   : > { %p880_p5 = pnand %p878_p3, %p875_p0 }
  0x1e   : > { %883 = shalt.err (!%p880_p5)
}
  0x1f   : > { %s884_s10 = scalar_lea.vmem %s162_s25, 256  ;;  %p892_p2 = scmp.lt.s32.totalorder %s162_s25, %s162_s25 }
  0x20   : > { %p885_p7 = scmp.ne.s32.totalorder %s162_s25, %s884_s10  ;;  %p893_p6 = scmp.lt.s32.totalorder %s884_s10, %s884_s10 }
  0x22   : > { %p887_p9 = pnand %p885_p7, %p873_p12  ;;  %p894_p4 = por %p893_p6, %p892_p2 }
  0x24   : > { %p888_p1 = pneg %p887_p9 }
  0x26   : > { %p895_p8 = pnand %p894_p4, %p888_p1 }
  0x28   : > { %898 = shalt.err (!%p895_p8)
}
  0x29   : > { %s1065_s11 = smov 64   ;;  %s1066_s12 = smov 4  }
  0x2a   : > { %795 = dma.hbm_to_vmem [thread:$0]  (!%p1152_p10), %s1398_s1, 256, %s162_s25, [#allocation7], %s1065_s11, %s1065_s11, %s1066_s12  }
  0x2b   : > { %s899_s27 = scalar_lea.hbm %s1399_s2, 16 }
  0x2c   : > { %p900_p11 = scmp.ne.s32.totalorder %s1399_s2, %s899_s27  ;;  %p906_p4 = scmp.lt.u32.totalorder %s899_s27, %s1399_s2 }
  0x2e   : > { %p902_p1 = pnand %p900_p11, %p873_p12 }
  0x30   : > { %p903_p2 = pneg %p902_p1 }
  0x32   : > { %p908_p6 = pnand %p906_p4, %p903_p2 }
  0x34   : > { %911 = shalt.err (!%p908_p6)
}
  0x35   : > { %s912_s25 = scalar_lea.vmem %s1156_s28, 16  ;;  %s919_s7 = scalar_lea.vmem %s1156_s28, 32 }
  0x36   : > { %p913_p8 = scmp.ne.s32.totalorder %s1156_s28, %s912_s25  ;;  %p920_p3 = scmp.lt.s32.totalorder %s1156_s28, %s1156_s28 }
  0x37   : > { %p921_p5 = scmp.lt.s32.totalorder %s919_s7, %s912_s25 }
  0x38   : > { %p915_p13 = pnand %p913_p8, %p873_p12 }
  0x39   : > { %p922_p7 = por %p921_p5, %p920_p3 }
  0x3a   : > { %p916_p0 = pneg %p915_p13 }
  0x3c   : > { %p923_p9 = pnand %p922_p7, %p916_p0 }
  0x3e   : > { %926 = shalt.err (!%p923_p9)
}
  0x3f   : > { %798 = dma.hbm_to_vmem [thread:$0]  (!%p1152_p10), %s1399_s2, 16, %s1156_s28, [#allocation7]  }
  0x40   : > { %s1207_s10 = sadd.s32 1, %s1061_s18   ;;  %s31_s26 = sadd.s32 1, %s1057_s17 }
  0x41   : > { %s28_s11 = ssub.s32 %s1061_s18, %s1207_s10  ;;  %p38_p12 = scmp.ne.s32.totalorder %s1057_s17, %s1053_s16 }
  0x42   : > { %p29_p11 = scmp.eq.s32.totalorder %s28_s11, 0  ;;  %p39_p1 = scmp.eq.s32.totalorder %s1061_s18, 0 }
  0x43   : > { %p1410_p2 = scmp.eq.s32.totalorder %s1125_s19, 3  ;;  %p812_p6 = scmp.lt.s32.totalorder %s1061_s18, 4 }
  0x44   : > { %s1223_s13 = scalar_select %p29_p11, %s1057_s17, %s31_s26  }
  0x45   : > { %p1217_p4 = por %p1410_p2, %p38_p12  ;;  %p40_p8 = por %p39_p1, %p38_p12 }
  0x46   : > { %s1226_s14 = sand.u32 1, %s1057_s17   ;;  %s716_s20 = sshll.u32 %s1061_s18, 6 }
  0x47   : > { %s1411_s12 = scalar_select %p1217_p4, 1, 0 }
  0x48   : > { %s715_s28 = sshll.u32 %s1226_s14, 2  ;;  %s1233_s29 = scalar_lea.hbm %s1397_s0, %s716_s20 }
  0x49   : > { %s190_s30 = scalar_lea.vmem [#allocation3], %s715_s28  ;;  %p1237_p10 = pnand %p812_p6, %p40_p8 }
  0x4a   : > { %s197_s5 = sshll.u32 %s190_s30, 4  ;;  %s717_s25 = sshll.u32 %s1061_s18, 4  ;;  %s1235_s5 = int_to_ptr.vmem [resolvable:$true] %s197_s5 }
  0x4b   : > { %s187_s7 = scalar_lea.sflag [#allocation4], %s1226_s14  ;;  %s927_s8 = scalar_lea.hbm %s1233_s29, 64 }
  0x4c   : > { %p928_p13 = scmp.ne.s32.totalorder %s1233_s29, %s927_s8  ;;  %p929_p0 = pneg %p1237_p10 }
  0x4d   : > { %s932_s11 = scalar_lea.hbm %s1397_s0, 256  ;;  %p933_p7 = scmp.lt.u32.totalorder %s1233_s29, %s1397_s0 }
  0x4e   : > { %p930_p3 = pnand %p929_p0, %p928_p13  ;;  %p934_p9 = scmp.lt.u32.totalorder %s932_s11, %s927_s8 }
  0x4f   : > { %p936_p11 = scmp.lt.u32.totalorder %s927_s8, %s1233_s29 }
  0x50   : > { %p931_p5 = pneg %p930_p3  ;;  %p935_p12 = por %p934_p9, %p933_p7 }
  0x52   : > { %p937_p1 = por %p936_p11, %p935_p12 }
  0x54   : > { %p938_p2 = pnand %p937_p1, %p931_p5 }
  0x56   : > { %941 = shalt.err (!%p938_p2)
}
  0x57   : > { %s942_s24 = scalar_lea.vmem %s1235_s5, 64  ;;  %s1067_s27 = smov [#allocation3]  }
  0x58   : > { %p943_p6 = scmp.ne.s32.totalorder %s1235_s5, %s942_s24  ;;  %s947_s30 = sshll.u32 %s1067_s27, 4  ;;  %s948_s30 = int_to_ptr.vmem [resolvable:$false] %s947_s30 }
  0x59   : > { %s949_s9 = scalar_lea.vmem %s948_s30, 128  ;;  %p950_p3 = scmp.lt.s32.totalorder %s1235_s5, %s948_s30 }
  0x5a   : > { %p945_p8 = pnand %p943_p6, %p929_p0  ;;  %p951_p7 = scmp.lt.s32.totalorder %s949_s9, %s942_s24 }
  0x5c   : > { %p946_p13 = pneg %p945_p8  ;;  %p952_p9 = por %p951_p7, %p950_p3 }
  0x5e   : > { %p953_p12 = pnand %p952_p9, %p946_p13 }
  0x60   : > { %956 = shalt.err (!%p953_p12)
}
  0x61   : > { %802 = dma.hbm_to_vmem [thread:$0]  (!%p1237_p10), %s1233_s29, 64, %s1235_s5, %s187_s7  }
  0x62   : > { %s1273_s11 = scalar_lea.hbm %s1400_s3, %s717_s25  ;;  %s207_s28 = scalar_lea.vmem [#allocation9], %s1226_s14 }
  0x63   : > { %s214_s20 = sshll.u32 %s207_s28, 4  ;;  %s205_s24 = scalar_lea.sflag [#allocation10], %s1226_s14  ;;  %s215_s20 = int_to_ptr.vmem [resolvable:$true] %s214_s20 }
  0x64   : > { %s957_s27 = scalar_lea.hbm %s1273_s11, 16  ;;  %s962_s7 = scalar_lea.hbm %s1400_s3, 64 }
  0x65   : > { %p958_p5 = scmp.ne.s32.totalorder %s1273_s11, %s957_s27  ;;  %p963_p2 = scmp.lt.u32.totalorder %s1273_s11, %s1400_s3 }
  0x66   : > { %p964_p6 = scmp.lt.u32.totalorder %s962_s7, %s957_s27  ;;  %p966_p13 = scmp.lt.u32.totalorder %s957_s27, %s1273_s11 }
  0x67   : > { %p960_p11 = pnand %p958_p5, %p929_p0 }
  0x68   : > { %p965_p8 = por %p964_p6, %p963_p2 }
  0x69   : > { %p961_p1 = pneg %p960_p11 }
  0x6a   : > { %p967_p3 = por %p966_p13, %p965_p8 }
  0x6c   : > { %p968_p7 = pnand %p967_p3, %p961_p1 }
  0x6e   : > { %971 = shalt.err (!%p968_p7)
}
  0x6f   : > { %s972_s14 = scalar_lea.vmem %s215_s20, 16  ;;  %s1068_s9 = smov [#allocation9]  }
  0x70   : > { %p973_p9 = scmp.ne.s32.totalorder %s215_s20, %s972_s14  ;;  %s977_s8 = sshll.u32 %s1068_s9, 4  ;;  %s978_s8 = int_to_ptr.vmem [resolvable:$false] %s977_s8 }
  0x71   : > { %s979_s26 = scalar_lea.vmem %s978_s8, 32  ;;  %p980_p11 = scmp.lt.s32.totalorder %s215_s20, %s978_s8 }
  0x72   : > { %p975_p12 = pnand %p973_p9, %p929_p0  ;;  %p981_p4 = scmp.lt.s32.totalorder %s979_s26, %s972_s14 }
  0x74   : > { %p976_p5 = pneg %p975_p12  ;;  %p982_p2 = por %p981_p4, %p980_p11 }
  0x76   : > { %p983_p6 = pnand %p982_p2, %p976_p5 }
  0x78   : > { %986 = shalt.err (!%p983_p6)
}
  0x79   : > { %805 = dma.hbm_to_vmem [thread:$0]  (!%p1237_p10), %s1273_s11, 16, %s215_s20, %s205_s24  }
  0x7a   : > { %p1413_p1 = scmp.ne.s32.totalorder %s1408_s23, 0 }
  0x7b   : > { %s1299_s28 = sand.u32 (!%p1413_p1), 1, %s1053_s16   ;;  %p1414_p4 = scmp.ne.s32.totalorder (!%p1413_p1), %s1406_s21, 0 }
  0x7c   : > { %223 = sbr.rel (%p1413_p1) target bundleno = 1375 (0x55f), region = 36  ;;  %s719_s27 = sshll.u32 (!%p1413_p1), %s1299_s28, 2 }
  0x7d   : > { %s226_s29 = scalar_lea.sflag (!%p1413_p1), [#allocation4], %s1299_s28  ;;  %s229_s5 = scalar_lea.vmem (!%p1413_p1), [#allocation3], %s719_s27 }
  0x83   : > { %1032 = dma.done.wait (%p1414_p4), %s226_s29, 64  }
  0x84   : > { %1034 = vsyncadd (%p1414_p4), %s226_s29, 4294967232  ;;  %p1415_p10 = scmp.eq.s32.totalorder %s1125_s19, 0 }
  0x86   : > { %1036 = dma.done.wait (%p1415_p10), [#allocation7], 272   ;;  %p1416_p0 = pmov %p1415_p10 }
  0x87   : > { %s243_s23 = scalar_lea.sflag [#allocation10], %s1299_s28  ;;  %s245_s6 = scalar_lea.vmem [#allocation9], %s1299_s28 }
  0x88   : > { %1038 = vsyncadd (%p1416_p0), [#allocation7], 4294967024 }
  0x89   : > { %1040 = dma.done.wait (%p1414_p4), %s243_s23, 16  }
  0x8a   : > { %1042 = vsyncadd (%p1414_p4), %s243_s23, 4294967280  ;;  %v1069_v0 = vmov 0.0   ;;  %vm1070_vm0 = vmmov 0   ;;  %v861_v1 = vld [vmem:[#allocation6] sm:$0xff]   ;;  %v862_v2 = vld [vmem:[#allocation6 + $0x8] sm:$0xff]   ;;  %vm300_vm1 = vcmask 261120   ;;  %v397_v16 = vlaneseq }
  0x8b   : > { %746 = vmatprep.subr.bf16.mxu0 %v1069_v0  ;;  %750 = vmatprep.mubr.msk.bf16.mxu0 %vm1070_vm0, %v1069_v0  ;;  %v275_v3 = vld [vmem:[%s229_s5] sm:$0xf]  ;;  %v723_v4 = vld [vmem:[#allocation8] ss:$0 sm:$0xff]  ;;  %s1071_s21 = smov 112   ;;  %s1072_s11 = smov 96  }
  0x8c   : > { %754 = vmatprep.subr.bf16.mxu1 %v1069_v0  ;;  %756 = vmatprep.mubr.msk.bf16.mxu1 %vm1070_vm0, %v1069_v0  ;;  %s1073_s20 = smov 80   ;;  %vm348_vm2 = vcmask 130048   ;;  %v276_v17 = vld [vmem:[%s245_s6] sm:$0x1]  ;;  %v398_v18 = vshrl.u32 %v397_v16, 7  ;;  %v1074_v20 = vmov 0  }
  0x8d   : > { %747 = vmatpush3.bf16.msra.mxu0 %v861_v1  ;;  %vm395_vm3 = vcmp.gt.f32.partialorder %v276_v17, 0.0  ;;  %vm403_vm5 = vcmask 64512   ;;  %s1075_s24 = smov 64   ;;  %s1076_s7 = smov 48   ;;  %vm421_vm6 = vcmask 1043456   ;;  %vm581_vm7 = vcmask 261248  }
  0x8e   : > { %748 = vmatprep.subr.bf16.mxu0 %v1069_v0  ;;  %v399_v19 = vsub.s32 0, %v398_v18  ;;  %v396_v21 = vsel %vm395_vm3, 1, %v1074_v20  ;;  %s1077_s25 = smov 16   ;;  %s732_s30 = sshll.u32 %s1125_s19, 6  ;;  %vm585_vm8 = vcmask 257024  }
  0x8f   : > { %s273_s14 = scalar_lea.vmem [#allocation11], %s719_s27  ;;  %s1354_s29 = scalar_lea.hbm %s1401_s4, %s732_s30 }
  0x90   : > { %v400_v22 = vrot.slane %v396_v21, %v399_v19  ;;  %s601_s9 = sshll.u32 %s273_s14, 4  ;;  %s588_s5 = scalar_lea.sflag [#allocation5], %s1299_s28  ;;  %s1356_s9 = int_to_ptr.vmem [resolvable:$true] %s601_s9 }
  0x91   : > { %749 = vmatpush3.bf16.msra.mxu0 %v862_v2  ;;  %s987_s23 = scalar_lea.vmem %s1356_s9, 64  ;;  %p1417_p13 = scmp.ne.s32.totalorder %s1411_s12, 0 }
  0x92   : > { %760 = vmatprep.subr.bf16.mxu0 %v1069_v0  ;;  %vm401_vm4 = vcmp.eq.s32.totalorder %v400_v22, 1  ;;  %p988_p8 = scmp.ne.s32.totalorder %s1356_s9, %s987_s23  ;;  %s1078_s19 = smov [#allocation11]  }
  0x93   : > { %s991_s27 = sshll.u32 %s1078_s19, 4  ;;  %s992_s27 = int_to_ptr.vmem [resolvable:$false] %s991_s27 }
  0x94   : > { %751 = vmatmul.mubr.msk.bf16.vlgmr.msra.gmra.mrb[0].mxu0 %vm300_vm1, %v275_v3  ;;  %p989_p3 = pnand %p988_p8, %p1417_p13  ;;  %s993_s6 = scalar_lea.vmem %s992_s27, 128 }
  0x95   : > { %762 = vmatprep.mubr.msk.bf16.mxu0 %vm1070_vm0, %v1069_v0  ;;  %p994_p9 = scmp.lt.s32.totalorder %s1356_s9, %s992_s27  ;;  %p995_p12 = scmp.lt.s32.totalorder %s993_s6, %s987_s23 }
  0x96   : > { %p990_p7 = pneg %p989_p3 }
  0x97   : > { %p996_p5 = por %p995_p12, %p994_p9 }
  0x99   : > { %p997_p11 = pnand %p996_p5, %p990_p7 }
 0x167   : > { %v338_v5 = vpop.f32.mrb[0].mxu0 }
 0x168   : > { %v339_v6 = vadd.f32 %v723_v4, %v338_v5  ;;  %v752_v7 = vpop.f32.mrb[1].mxu0 }
 0x169   : > { %v341_v8 = vpop.f32.mrb[2].mxu0 }
 0x16a   : > { %v344_v9 = vpack.c.bf16 %v339_v6, %v339_v6  ;;  %v753_v10 = vpop.f32.mrb[3].mxu0 }
 0x16c   : > { %466 = vrot.lane.b32.xlu1 %v344_v9, %s1071_s21  ;;  %346 = vrot.lane.b32.xlu0 %v344_v9, %s1072_s11 }
 0x170   : > { %468 = vrot.lane.b32.xlu0 %v344_v9, %s1073_s20 }
 0x1de   : > { %v347_v11 = vpop.permute.xlu0 %346  ;;  %v467_v15 = vpop.permute.xlu1 %466 }
 0x1df   : > { %v353_v12 = vsel %vm348_vm2, %v347_v11, 0 }
 0x1e0   : > { %755 = vmatpush3.bf16.xpose.msra.mxu1 %v353_v12 }
 0x1e1   : > { %766 = vmatprep.subr.bf16.mxu1 %v1069_v0 }
 0x1e2   : > { %v469_v13 = vpop.permute.xlu0 %468 }
 0x1e3   : > { %v474_v14 = vsel %vm348_vm2, %v469_v13, 0 }
 0x1e7   : > { %757 = vmatmul.mubr.msk.bf16.vlgmr.msra.gmra.mrb[0].mxu1 %vm348_vm2, %v344_v9 }
 0x1e8   : > { %767 = vmatpush3.bf16.xpose.msra.mxu1 %v474_v14  ;;  %768 = vmatprep.mubr.msk.bf16.mxu1 %vm1070_vm0, %v1069_v0 }
 0x1ef   : > { %769 = vmatmul.mubr.msk.bf16.vlgmr.msra.gmra.mrb[4].mxu1 %vm348_vm2, %v467_v15 }
 0x2ba   : > { %v389_v23 = vpop.f32.mrb[0].mxu1 }
 0x2bb   : > { %v402_v24 = vsel %vm401_vm4, %v389_v23, -1e+09  ;;  %v758_v25 = vpop.f32.mrb[1].mxu1 }
 0x2bc   : > { %v392_v26 = vpop.f32.mrb[2].mxu1  ;;  %v404_v27 = vsel %vm403_vm5, %v402_v24, -inf }
 0x2bd   : > { %405 = vmax.xlane.f32.xlu1 %v404_v27  ;;  %v759_v28 = vpop.f32.mrb[3].mxu1 }
 0x2c2   : > { %v510_v29 = vpop.f32.mrb[4].mxu1 }
 0x2c3   : > { %v516_v30 = vsel %vm401_vm4, %v510_v29, -1e+09  ;;  %v770_v31 = vpop.f32.mrb[5].mxu1 }
 0x2c4   : > { %v513_v32 = vpop.f32.mrb[6].mxu1  ;;  %v517_v33 = vsel %vm403_vm5, %v516_v30, -inf }
 0x2c5   : > { %518 = vmax.xlane.f32.xlu0 %v517_v33  ;;  %v771_v34 = vpop.f32.mrb[7].mxu1 }
 0x34a   : > { %v406_v35 = vpop.xlane.xlu1 %405 }
 0x34b   : > { %v407_v36 = vsub.f32 %v402_v24, %v406_v35 }
 0x34d   : > { %v408_v37 = vmul.f32 1.442695, %v407_v36 }
 0x34f   : > { %863 = vpow2.f32 %v408_v37 }
 0x352   : > { %v519_v38 = vpop.xlane.xlu0 %518 }
 0x353   : > { %v520_v39 = vsub.f32 %v516_v30, %v519_v38 }
 0x355   : > { %v521_v40 = vmul.f32 1.442695, %v520_v39 }
 0x357   : > { %865 = vpow2.f32 %v521_v40 }
 0x359   : > { %v864_v41 = vpop.eup %863 }
 0x35a   : > { %v410_v42 = vsel %vm403_vm5, %v864_v41, 0.0 }
 0x35b   : > { %411 = vadd.xlane.f32.xlu0 %v410_v42 }
 0x361   : > { %v866_v43 = vpop.eup %865 }
 0x362   : > { %v523_v44 = vsel %vm403_vm5, %v866_v43, 0.0 }
 0x363   : > { %524 = vadd.xlane.f32.xlu1 %v523_v44 }
 0x371   : > { %416 = vrot.lane.b32.xlu0 %v344_v9, %s1075_s24 }
 0x374   : > { %529 = vrot.lane.b32.xlu1 %v344_v9, %s1076_s7 }
 0x3e8   : > { %v412_v45 = vpop.xlane.xlu0 %411 }
 0x3e9   : > { %867 = vrcp.f32 %v412_v45 }
 0x3ec   : > { %v417_v46 = vpop.permute.xlu0 %416 }
 0x3ed   : > { %v423_v47 = vsel %vm421_vm6, %v417_v46, 0 }
 0x3ee   : > { %761 = vmatpush3.bf16.msra.mxu0 %v423_v47 }
 0x3ef   : > { %772 = vmatprep.subr.bf16.mxu0 %v1069_v0 }
 0x3f0   : > { %v525_v48 = vpop.xlane.xlu1 %524 }
 0x3f1   : > { %869 = vrcp.f32 %v525_v48 }
 0x3f3   : > { %v868_v49 = vpop.eup %867 }
 0x3f4   : > { %v414_v50 = vmul.f32 %v868_v49, %v864_v41  ;;  %v530_v51 = vpop.permute.xlu1 %529 }
 0x3f5   : > { %v535_v53 = vsel %vm421_vm6, %v530_v51, 0 }
 0x3f6   : > { %v415_v52 = vpack.c.bf16 %v414_v50, %v414_v50 }
 0x3f8   : > { %763 = vmatmul.mubr.msk.bf16.vlgmr.msra.gmra.mrb[4].mxu0 %vm403_vm5, %v415_v52 }
 0x3f9   : > { %773 = vmatpush3.bf16.msra.mxu0 %v535_v53  ;;  %774 = vmatprep.mubr.msk.bf16.mxu0 %vm1070_vm0, %v1069_v0 }
 0x3fb   : > { %v870_v54 = vpop.eup %869 }
 0x3fc   : > { %v527_v55 = vmul.f32 %v870_v54, %v866_v43 }
 0x3fe   : > { %v528_v56 = vpack.c.bf16 %v527_v55, %v527_v55 }
 0x400   : > { %775 = vmatmul.mubr.msk.bf16.vlgmr.msra.gmra.mrb[8].mxu0 %vm403_vm5, %v528_v56 }
 0x4cb   : > { %v459_v57 = vpop.f32.mrb[4].mxu0 }
 0x4cc   : > { %465 = vst.msk [vmem:[#allocation2] sm:$0xff] %vm348_vm2, %v459_v57  ;;  %v764_v58 = vpop.f32.mrb[5].mxu0 }
 0x4cd   : > { %v462_v59 = vpop.f32.mrb[6].mxu0 }
 0x4ce   : > { %v765_v60 = vpop.f32.mrb[7].mxu0 }
 0x4d3   : > { %v571_v61 = vpop.f32.mrb[8].mxu0 }
 0x4d4   : > { %578 = vrot.lane.b32.xlu1 %v571_v61, %s1077_s25  ;;  %v776_v62 = vpop.f32.mrb[9].mxu0 }
 0x4d5   : > { %v574_v63 = vpop.f32.mrb[10].mxu0 }
 0x4d6   : > { %v777_v0 = vpop.f32.mrb[11].mxu0 }
 0x546   : > { %v579_v1 = vpop.permute.xlu1 %578 }
 0x547   : > { %582 = vst.msk [vmem:[#allocation2] sm:$0xff] %vm581_vm7, %v579_v1 }
 0x54e   : > { %v583_v2 = vld [vmem:[#allocation2] sm:$0xff] }
 0x54f   : > { %v584_v3 = vpack.c.bf16 %v583_v2, %v583_v2 }
 0x551   : > { %586 = vst.msk [vmem:[%s273_s14] sm:$0xf] %vm585_vm8, %v584_v3 }
 0x552   : > { %1000 = shalt.err (!%p997_p11)
}
 0x553   : > { %s1001_s28 = scalar_lea.hbm %s1354_s29, 64  ;;  %s1005_s20 = scalar_lea.hbm %s1401_s4, 256 }
 0x554   : > { %p1002_p2 = scmp.ne.s32.totalorder %s1354_s29, %s1001_s28  ;;  %p1006_p4 = scmp.lt.u32.totalorder %s1354_s29, %s1401_s4 }
 0x555   : > { %p1007_p10 = scmp.lt.u32.totalorder %s1005_s20, %s1001_s28  ;;  %p1009_p8 = scmp.lt.u32.totalorder %s1001_s28, %s1354_s29 }
 0x556   : > { %p1003_p6 = pnand %p1002_p2, %p1417_p13 }
 0x557   : > { %p1008_p0 = por %p1007_p10, %p1006_p4 }
 0x558   : > { %p1004_p1 = pneg %p1003_p6 }
 0x559   : > { %p1010_p3 = por %p1009_p8, %p1008_p0 }
 0x55b   : > { %p1011_p7 = pnand %p1010_p3, %p1004_p1 }
 0x55d   : > { %1014 = shalt.err (!%p1011_p7)
}
 0x55e   : > { %790 = dma.vmem_to_hbm [thread:$0]  (%p1417_p13), %s1356_s9, 64, %s1354_s29, %s588_s5  }
 0x55f PF: > { %p815_p9 = scmp.ge.s32.totalorder %s1061_s18, 2  ;;  %s613_s25 = sand.u32 1, %s1049_s15  }
 0x560   : > { %p1418_p12 = scmp.ne.s32.totalorder %s1407_s22, 0  ;;  %s614_s30 = scalar_lea.sflag [#allocation5], %s613_s25 }
 0x562   : > { %p807_p5 = pnand %p815_p9, %p1418_p12 }
 0x564   : > { %1044 = dma.done.wait (!%p807_p5), %s614_s30, 64  }
 0x565   : > { %1046 = vsyncadd (!%p807_p5), %s614_s30, 4294967232  ;;  %p21_p11 = scmp.ge.s32.totalorder %s1207_s10, 6   ;;  %s1419_s15 = smov %s1053_s16 }
 0x566   : > { %s1420_s16 = smov %s1057_s17  ;;  %s1421_s17 = smov %s1223_s13 }
 0x567   : > { %s1422_s18 = smov %s1207_s10  ;;  %23 = sbr.rel (!%p21_p11) target bundleno = 8 (0x8), region = 102 }
 0x56e   :  { %619 = vsyncpa [#allocation4], 1 }
 0x56f   :  { %621 = vsyncpa [#allocation4 + $0x1], 1 }
 0x570   :  { %622 = vsyncpa [#allocation7], 1 }
 0x571   :  { %623 = vsyncpa [#allocation10], 1 }
 0x572   :  { %625 = vsyncpa [#allocation10 + $0x1], 1 }
 0x573   :  { %626 = vsyncpa [#allocation5], 1 }
 0x574   :  { %628 = vsyncpa [#allocation5 + $0x1], 1 }

// kernel: siamese_forward.14
= control target key start
LH: loop header
LB: loop body
LE: loop exit
PB: predicated region body
PF: predicated region fallthrough
CT: control target
= control target key end

     0   :  { %11 = vsyncpa [#allocation4], 0  ;;  %s773_s0 = inlined_call_operand.hbm [shape: bf16[32,64], index: 0, kind: input, shape index: {}]   ;;  %s774_s1 = inlined_call_operand.hbm [shape: bf16[64,32], index: 1, kind: input, shape index: {}]   ;;  %s775_s2 = inlined_call_operand.hbm [shape: f32[1,32], index: 2, kind: input, shape index: {}]   ;;  %s776_s3 = inlined_call_operand.hbm [shape: bf16[32,32], index: 3, kind: input, shape index: {}]   ;;  %s777_s4 = inlined_call_operand.hbm [shape: f32[1,32], index: 4, kind: input, shape index: {}]   ;;  %s778_s5 = inlined_call_operand.hbm [shape: f32[1,32], index: 5, kind: input, shape index: {}]   ;;  %s779_s6 = inlined_call_operand.hbm [shape: bf16[32,32], index: 6, kind: output, shape index: {}]  }
   0x1   :  { %12 = vsyncpa [#allocation7], 0 }
   0x2   :  { %13 = vsyncpa [#allocation10], 0 }
   0x3   :  { %14 = vsyncpa [#allocation13], 0 }
   0x4   :  { %15 = vsyncpa [#allocation5], 0  ;;  %s605_s21 = smov [#allocation6]   ;;  %s606_s23 = smov [#allocation9]  }
   0x5   :  { %s33_s22 = sshll.u32 %s605_s21, 4  ;;  %s55_s24 = sshll.u32 %s606_s23, 4  ;;  %s34_s22 = int_to_ptr.vmem [resolvable:$true] %s33_s22  ;;  %s650_s24 = int_to_ptr.vmem [resolvable:$true] %s55_s24 }
   0x6   :  { %s441_s27 = scalar_lea.hbm %s774_s1, 512 }
   0x7   :  { %p442_p0 = scmp.ne.s32.totalorder %s774_s1, %s441_s27  ;;  %p445_p1 = scmp.lt.u32.totalorder %s441_s27, %s774_s1 }
   0x9   :  { %p447_p2 = pnand %p445_p1, %p442_p0 }
   0xb   :  { %450 = shalt.err (!%p447_p2)
}
   0xc   :  { %s451_s8 = scalar_lea.vmem %s34_s22, 512  ;;  %p456_p4 = scmp.lt.s32.totalorder %s34_s22, %s34_s22 }
   0xd   :  { %p452_p3 = scmp.ne.s32.totalorder %s34_s22, %s451_s8  ;;  %p457_p5 = scmp.lt.s32.totalorder %s451_s8, %s451_s8 }
   0xf   :  { %p458_p6 = por %p457_p5, %p456_p4 }
  0x11   :  { %p459_p7 = pnand %p458_p6, %p452_p3 }
  0x13   :  { %462 = shalt.err (!%p459_p7)
}
  0x14   :  { %s607_s9 = smov 64   ;;  %s608_s10 = smov 4  }
  0x15   :  { %39 = dma.hbm_to_vmem [thread:$0]  %s774_s1, 512, %s34_s22, [#allocation7], %s607_s9, %s607_s9, %s608_s10  }
  0x16   :  { %s463_s15 = scalar_lea.hbm %s776_s3, 256 }
  0x17   :  { %p464_p8 = scmp.ne.s32.totalorder %s776_s3, %s463_s15  ;;  %p467_p9 = scmp.lt.u32.totalorder %s463_s15, %s776_s3 }
  0x19   :  { %p469_p10 = pnand %p467_p9, %p464_p8 }
  0x1b   :  { %472 = shalt.err (!%p469_p10)
}
  0x1c   :  { %s473_s20 = scalar_lea.vmem %s650_s24, 256  ;;  %p478_p12 = scmp.lt.s32.totalorder %s650_s24, %s650_s24 }
  0x1d   :  { %p474_p11 = scmp.ne.s32.totalorder %s650_s24, %s473_s20  ;;  %p479_p13 = scmp.lt.s32.totalorder %s473_s20, %s473_s20 }
  0x1f   :  { %p480_p0 = por %p479_p13, %p478_p12 }
  0x21   :  { %p481_p1 = pnand %p480_p0, %p474_p11 }
  0x23   :  { %484 = shalt.err (!%p481_p1)
}
  0x24   :  { %61 = dma.hbm_to_vmem [thread:$0]  %s776_s3, 256, %s650_s24, [#allocation10], %s607_s9, %s607_s9, %s608_s10  }
  0x25   :  { %s609_s22 = smov [#allocation3]   ;;  %s610_s25 = smov [#allocation8]  }
  0x26   :  { %s21_s23 = sshll.u32 %s609_s22, 4  ;;  %s46_s26 = sshll.u32 %s610_s25, 4  ;;  %s22_s23 = int_to_ptr.vmem [resolvable:$true] %s21_s23  ;;  %s47_s26 = int_to_ptr.vmem [resolvable:$true] %s46_s26 }
  0x27   :  { %s485_s29 = scalar_lea.hbm %s773_s0, 256 }
  0x28   :  { %p486_p2 = scmp.ne.s32.totalorder %s773_s0, %s485_s29  ;;  %p489_p3 = scmp.lt.u32.totalorder %s485_s29, %s773_s0 }
  0x2a   :  { %p491_p4 = pnand %p489_p3, %p486_p2 }
  0x2c   :  { %494 = shalt.err (!%p491_p4)
}
  0x2d   :  { %s495_s3 = scalar_lea.vmem %s22_s23, 256  ;;  %p500_p6 = scmp.lt.s32.totalorder %s22_s23, %s22_s23 }
  0x2e   :  { %p496_p5 = scmp.ne.s32.totalorder %s22_s23, %s495_s3  ;;  %p501_p7 = scmp.lt.s32.totalorder %s495_s3, %s495_s3 }
  0x30   :  { %p502_p8 = por %p501_p7, %p500_p6 }
  0x32   :  { %p503_p9 = pnand %p502_p8, %p496_p5 }
  0x34   :  { %506 = shalt.err (!%p503_p9)
}
  0x35   :  { %27 = dma.hbm_to_vmem [thread:$0]  %s773_s0, 256, %s22_s23, [#allocation4], %s607_s9, %s607_s9, %s608_s10  }
  0x36   :  { %s507_s15 = scalar_lea.hbm %s775_s2, 16 }
  0x37   :  { %p508_p10 = scmp.ne.s32.totalorder %s775_s2, %s507_s15  ;;  %p511_p11 = scmp.lt.u32.totalorder %s507_s15, %s775_s2 }
  0x39   :  { %p513_p12 = pnand %p511_p11, %p508_p10 }
  0x3b   :  { %516 = shalt.err (!%p513_p12)
}
  0x3c   :  { %s517_s20 = scalar_lea.vmem %s47_s26, 16  ;;  %s521_s1 = scalar_lea.vmem %s47_s26, 32 }
  0x3d   :  { %p518_p13 = scmp.ne.s32.totalorder %s47_s26, %s517_s20  ;;  %p522_p0 = scmp.lt.s32.totalorder %s47_s26, %s47_s26 }
  0x3e   :  { %p523_p1 = scmp.lt.s32.totalorder %s521_s1, %s517_s20 }
  0x40   :  { %p524_p2 = por %p523_p1, %p522_p0 }
  0x42   :  { %p525_p3 = pnand %p524_p2, %p518_p13 }
  0x44   :  { %528 = shalt.err (!%p525_p3)
}
  0x45   :  { %49 = dma.hbm_to_vmem [thread:$0]  %s775_s2, 16, %s47_s26, [#allocation7]  }
  0x46   :  { %s611_s22 = smov [#allocation11]   ;;  %s612_s25 = smov [#allocation12]  }
  0x47   :  { %s68_s23 = sshll.u32 %s611_s22, 4  ;;  %s78_s27 = sshll.u32 %s612_s25, 4  ;;  %s69_s23 = int_to_ptr.vmem [resolvable:$true] %s68_s23  ;;  %s79_s27 = int_to_ptr.vmem [resolvable:$true] %s78_s27 }
  0x48   :  { %s529_s30 = scalar_lea.hbm %s777_s4, 16 }
  0x49   :  { %p530_p4 = scmp.ne.s32.totalorder %s777_s4, %s529_s30  ;;  %p533_p5 = scmp.lt.u32.totalorder %s529_s30, %s777_s4 }
  0x4b   :  { %p535_p6 = pnand %p533_p5, %p530_p4 }
  0x4d   :  { %538 = shalt.err (!%p535_p6)
}
  0x4e   :  { %s539_s2 = scalar_lea.vmem %s69_s23, 16  ;;  %s543_s26 = scalar_lea.vmem %s69_s23, 32 }
  0x4f   :  { %p540_p7 = scmp.ne.s32.totalorder %s69_s23, %s539_s2  ;;  %p544_p8 = scmp.lt.s32.totalorder %s69_s23, %s69_s23 }
  0x50   :  { %p545_p9 = scmp.lt.s32.totalorder %s543_s26, %s539_s2 }
  0x52   :  { %p546_p10 = por %p545_p9, %p544_p8 }
  0x54   :  { %p547_p11 = pnand %p546_p10, %p540_p7 }
  0x56   :  { %550 = shalt.err (!%p547_p11)
}
  0x57   :  { %71 = dma.hbm_to_vmem [thread:$0]  %s777_s4, 16, %s69_s23, [#allocation10]  }
  0x58   :  { %s551_s15 = scalar_lea.hbm %s778_s5, 16 }
  0x59   :  { %p552_p12 = scmp.ne.s32.totalorder %s778_s5, %s551_s15  ;;  %p555_p13 = scmp.lt.u32.totalorder %s551_s15, %s778_s5 }
  0x5b   :  { %p557_p0 = pnand %p555_p13, %p552_p12 }
  0x5d   :  { %560 = shalt.err (!%p557_p0)
}
  0x5e   :  { %s561_s20 = scalar_lea.vmem %s79_s27, 16  ;;  %s565_s1 = scalar_lea.vmem %s79_s27, 32 }
  0x5f   :  { %p562_p1 = scmp.ne.s32.totalorder %s79_s27, %s561_s20  ;;  %p566_p2 = scmp.lt.s32.totalorder %s79_s27, %s79_s27 }
  0x60   :  { %p567_p3 = scmp.lt.s32.totalorder %s565_s1, %s561_s20 }
  0x62   :  { %p568_p4 = por %p567_p3, %p566_p2 }
  0x64   :  { %p569_p5 = pnand %p568_p4, %p562_p1 }
  0x66   :  { %572 = shalt.err (!%p569_p5)
}
  0x67   :  { %81 = dma.hbm_to_vmem [thread:$0]  %s778_s5, 16, %s79_s27, [#allocation13]  }
  0x68   :  { %595 = dma.done.wait [#allocation4], 256  }
  0x69   :  { %596 = vsyncadd [#allocation4], 4294967040 }
  0x6a   :  { %597 = dma.done.wait [#allocation7], 528  }
  0x6b   :  { %598 = vsyncadd [#allocation7], 4294966768 }
  0x6c   :  { %599 = dma.done.wait [#allocation10], 272  }
  0x6d   :  { %600 = vsyncadd [#allocation10], 4294967024 }
  0x6e   :  { %601 = dma.done.wait [#allocation13], 16  }
  0x6f   :  { %602 = vsyncadd [#allocation13], 4294967280  ;;  %vm105_vm0 = vcmask 261120   ;;  %v613_v0 = vmov 0.0   ;;  %v427_v1 = vld [vmem:[#allocation6] sm:$0xff]   ;;  %v428_v2 = vld [vmem:[#allocation6 + $0x8] sm:$0xff]  }
  0x70   :  { %108 = vst.msk [vmem:[#allocation2 + $0x10] sm:$0xff] %vm105_vm0, %v613_v0  ;;  %106 = vst.msk [vmem:[#allocation2] sm:$0xff] %vm105_vm0, %v613_v0  ;;  %405 = vmatprep.subr.bf16.mxu0 %v427_v1  ;;  %v429_v3 = vld [vmem:[#allocation6 + $0x10] sm:$0xff]   ;;  %vm160_vm1 = vcmask 523264   ;;  %v430_v5 = vld [vmem:[#allocation6 + $0x18] sm:$0xff]   ;;  %vm346_vm2 = vcmask 257024  }
  0x71   :  { %107 = vst.msk [vmem:[#allocation2 + $0x8] sm:$0xff] %vm105_vm0, %v613_v0  ;;  %109 = vst.msk [vmem:[#allocation2 + $0x18] sm:$0xff] %vm105_vm0, %v613_v0  ;;  %406 = vmatpush3.bf16.msra.mxu0 %v427_v1  ;;  %v431_v4 = vld [vmem:[#allocation3] sm:$0xff]   ;;  %v432_v6 = vld [vmem:[#allocation3 + $0x8] sm:$0xff]   ;;  %s614_s5 = smov [#allocation14]  }
  0x72   :  { %407 = vmatprep.subr.bf16.mxu0 %v428_v2  ;;  %413 = vmatprep.mubr.msk.bf16.mxu0 %vm160_vm1, %v431_v4  ;;  %v398_v19 = vld [vmem:[#allocation9 + $0x8] sm:$0xff]   ;;  %v391_v20 = vld [vmem:[#allocation9] sm:$0xff]   ;;  %v379_v21 = vld [vmem:[#allocation8] ss:$0 sm:$0xff]  ;;  %s356_s21 = sshll.u32 %s614_s5, 4  ;;  %s357_s21 = int_to_ptr.vmem [resolvable:$true] %s356_s21 }
  0x73   :  { %v396_v22 = vunpack.c.l.bf16 %v398_v19  ;;  %v392_v24 = vunpack.c.l.bf16 %v391_v20  ;;  %v397_v27 = vunpack.c.h.bf16 %v398_v19  ;;  %v393_v30 = vunpack.c.h.bf16 %v391_v20  ;;  %s573_s22 = scalar_lea.vmem %s357_s21, 256  ;;  %p578_p7 = scmp.lt.s32.totalorder %s357_s21, %s357_s21 }
  0x74   :  { %p574_p6 = scmp.ne.s32.totalorder %s357_s21, %s573_s22  ;;  %p579_p8 = scmp.lt.s32.totalorder %s573_s22, %s573_s22 }
  0x75   :  { %408 = vmatpush3.bf16.msra.mxu0 %v428_v2 }
  0x76   :  { %409 = vmatprep.subr.bf16.mxu0 %v429_v3  ;;  %p580_p9 = por %p579_p8, %p578_p7 }
  0x77   :  { %v112_v7 = vld [vmem:[#allocation2 + $0x10] sm:$0xff]  ;;  %v110_v8 = vld [vmem:[#allocation2] sm:$0xff] }
  0x78   :  { %v113_v10 = vld [vmem:[#allocation2 + $0x18] sm:$0xff]  ;;  %v111_v13 = vld [vmem:[#allocation2 + $0x8] sm:$0xff]  ;;  %p581_p10 = pnand %p580_p9, %p574_p6 }
  0x79   :  { %410 = vmatpush3.bf16.msra.mxu0 %v429_v3 }
  0x7a   :  { %411 = vmatprep.subr.bf16.mxu0 %v430_v5 }
  0x7d   :  { %412 = vmatpush3.bf16.msra.mxu0 %v430_v5 }
  0x80   :  { %414 = vmatmul.mubr.msk.bf16.vlgmr.msra.gmra.mrb[0].mxu0 %vm160_vm1, %v432_v6 }
 0x153   :  { %v415_v9 = vpop.f32.mrb[0].mxu0 }
 0x154   :  { %v218_v11 = vadd.f32 %v415_v9, %v112_v7  ;;  %v201_v12 = vpop.f32.mrb[1].mxu0 }
 0x155   :  { %v216_v14 = vadd.f32 %v201_v12, %v110_v8  ;;  %v416_v15 = vpop.f32.mrb[2].mxu0 }
 0x156   :  { %223 = vst.msk [vmem:[#allocation2 + $0x10] sm:$0xff] %vm105_vm0, %v218_v11  ;;  %v219_v16 = vadd.f32 %v416_v15, %v113_v10  ;;  %v204_v17 = vpop.f32.mrb[3].mxu0  ;;  %v380_v11 = vld [vmem:[#allocation11] ss:$0 sm:$0xff] }
 0x157   :  { %221 = vst.msk [vmem:[#allocation2] sm:$0xff] %vm105_vm0, %v216_v14  ;;  %v217_v18 = vadd.f32 %v204_v17, %v111_v13  ;;  %v381_v13 = vld [vmem:[#allocation12] ss:$0 sm:$0xff] }
 0x158   :  { %224 = vst.msk [vmem:[#allocation2 + $0x18] sm:$0xff] %vm105_vm0, %v219_v16 }
 0x159   :  { %222 = vst.msk [vmem:[#allocation2 + $0x8] sm:$0xff] %vm105_vm0, %v217_v18 }
 0x15d   :  { %v230_v23 = vld [vmem:[#allocation2 + $0x10] sm:$0xff] }
 0x15e   :  { %v241_v25 = vadd.f32 %v379_v21, %v230_v23  ;;  %v228_v26 = vld [vmem:[#allocation2] sm:$0xff] }
 0x15f   :  { %v239_v28 = vadd.f32 %v379_v21, %v228_v26  ;;  %v231_v29 = vld [vmem:[#allocation2 + $0x18] sm:$0xff] }
 0x160   :  { %v253_v31 = vadd.f32 %v396_v22, %v241_v25  ;;  %v242_v32 = vadd.f32 %v379_v21, %v231_v29  ;;  %v229_v33 = vld [vmem:[#allocation2 + $0x8] sm:$0xff] }
 0x161   :  { %v251_v34 = vadd.f32 %v392_v24, %v239_v28  ;;  %v240_v35 = vadd.f32 %v379_v21, %v229_v33 }
 0x162   :  { %v261_v36 = vsel %vm105_vm0, %v253_v31, 0.0  ;;  %v254_v37 = vadd.f32 %v397_v27, %v242_v32 }
 0x163   :  { %262 = vadd.xlane.f32.xlu1 %v261_v36  ;;  %v255_v38 = vsel %vm105_vm0, %v251_v34, 0.0  ;;  %v252_v39 = vadd.f32 %v393_v30, %v240_v35 }
 0x164   :  { %256 = vadd.xlane.f32.xlu0 %v255_v38  ;;  %v264_v40 = vsel %vm105_vm0, %v254_v37, 0.0 }
 0x165   :  { %v258_v41 = vsel %vm105_vm0, %v252_v39, 0.0 }
 0x167   :  { %265 = vadd.xlane.f32.xlu1 %v264_v40 }
 0x168   :  { %259 = vadd.xlane.f32.xlu0 %v258_v41 }
 0x1f0   :  { %v263_v42 = vpop.xlane.xlu1 %262 }
 0x1f1   :  { %v270_v43 = vmul.f32 0.03125, %v263_v42  ;;  %v257_v44 = vpop.xlane.xlu0 %256 }
 0x1f2   :  { %v268_v45 = vmul.f32 0.03125, %v257_v44 }
 0x1f3   :  { %v274_v46 = vsub.f32 %v253_v31, %v270_v43 }
 0x1f4   :  { %v272_v47 = vsub.f32 %v251_v34, %v268_v45  ;;  %v266_v48 = vpop.xlane.xlu1 %265 }
 0x1f5   :  { %v271_v49 = vmul.f32 0.03125, %v266_v48  ;;  %v260_v50 = vpop.xlane.xlu0 %259  ;;  %v278_v56 = vmul.f32 %v274_v46, %v274_v46 }
 0x1f6   :  { %v269_v51 = vmul.f32 0.03125, %v260_v50  ;;  %v276_v52 = vmul.f32 %v272_v47, %v272_v47 }
 0x1f7   :  { %v275_v53 = vsub.f32 %v254_v37, %v271_v49  ;;  %v286_v58 = vsel %vm105_vm0, %v278_v56, 0.0 }
 0x1f8   :  { %v273_v54 = vsub.f32 %v252_v39, %v269_v51  ;;  %v280_v55 = vsel %vm105_vm0, %v276_v52, 0.0 }
 0x1f9   :  { %281 = vadd.xlane.f32.xlu0 %v280_v55  ;;  %v279_v60 = vmul.f32 %v275_v53, %v275_v53 }
 0x1fa   :  { %v277_v57 = vmul.f32 %v273_v54, %v273_v54 }
 0x1fb   :  { %v289_v61 = vsel %vm105_vm0, %v279_v60, 0.0 }
 0x1fc   :  { %v283_v59 = vsel %vm105_vm0, %v277_v57, 0.0 }
 0x1fd   :  { %287 = vadd.xlane.f32.xlu0 %v286_v58  ;;  %284 = vadd.xlane.f32.xlu1 %v283_v59 }
 0x201   :  { %290 = vadd.xlane.f32.xlu1 %v289_v61 }
 0x286   :  { %v282_v62 = vpop.xlane.xlu0 %281 }
 0x287   :  { %v292_v63 = vmul.f32 0.03125, %v282_v62 }
 0x289   :  { %v296_v0 = vadd.f32 1e-05, %v292_v63 }
 0x28a   :  { %v285_v1 = vpop.xlane.xlu1 %284  ;;  %v288_v2 = vpop.xlane.xlu0 %287 }
 0x28b   :  { %433 = vrsqrt.f32 %v296_v0  ;;  %v293_v3 = vmul.f32 0.03125, %v285_v1  ;;  %v294_v4 = vmul.f32 0.03125, %v288_v2 }
 0x28d   :  { %v297_v5 = vadd.f32 1e-05, %v293_v3  ;;  %v298_v6 = vadd.f32 1e-05, %v294_v4 }
 0x28e   :  { %v291_v7 = vpop.xlane.xlu1 %290 }
 0x28f   :  { %435 = vrsqrt.f32 %v297_v5  ;;  %v295_v8 = vmul.f32 0.03125, %v291_v7 }
 0x290   :  { %437 = vrsqrt.f32 %v298_v6 }
 0x291   :  { %v299_v9 = vadd.f32 1e-05, %v295_v8 }
 0x293   :  { %439 = vrsqrt.f32 %v299_v9 }
 0x295   :  { %v434_v10 = vpop.eup %433 }
 0x296   :  { %v304_v12 = vmul.f32 %v434_v10, %v272_v47 }
 0x298   :  { %v315_v14 = vmul.f32 %v380_v11, %v304_v12 }
 0x299   :  { %v436_v15 = vpop.eup %435 }
 0x29a   :  { %v438_v16 = vpop.eup %437  ;;  %v305_v17 = vmul.f32 %v436_v15, %v273_v54  ;;  %v326_v18 = vadd.f32 %v381_v13, %v315_v14 }
 0x29b   :  { %v306_v19 = vmul.f32 %v438_v16, %v274_v46 }
 0x29c   :  { %v316_v20 = vmul.f32 %v380_v11, %v305_v17  ;;  %v386_v21 = vpack.c.bf16 %v326_v18, %v326_v18 }
 0x29d   :  { %v440_v22 = vpop.eup %439  ;;  %v317_v23 = vmul.f32 %v380_v11, %v306_v19 }
 0x29e   :  { %v307_v24 = vmul.f32 %v440_v22, %v275_v53  ;;  %v327_v25 = vadd.f32 %v381_v13, %v316_v20  ;;  %347 = vst.msk [vmem:[#allocation14] sm:$0xf] %vm346_vm2, %v386_v21 }
 0x29f   :  { %v328_v26 = vadd.f32 %v381_v13, %v317_v23 }
 0x2a0   :  { %v318_v27 = vmul.f32 %v380_v11, %v307_v24  ;;  %v387_v28 = vpack.c.bf16 %v327_v25, %v327_v25 }
 0x2a1   :  { %v388_v29 = vpack.c.bf16 %v328_v26, %v328_v26 }
 0x2a2   :  { %v329_v30 = vadd.f32 %v381_v13, %v318_v27  ;;  %348 = vst.msk [vmem:[#allocation14 + $0x4] sm:$0xf] %vm346_vm2, %v387_v28 }
 0x2a3   :  { %349 = vst.msk [vmem:[#allocation14 + $0x8] sm:$0xf] %vm346_vm2, %v388_v29 }
 0x2a4   :  { %v389_v31 = vpack.c.bf16 %v329_v30, %v329_v30 }
 0x2a6   :  { %350 = vst.msk [vmem:[#allocation14 + $0xc] sm:$0xf] %vm346_vm2, %v389_v31 }
 0x2a7   :  { %584 = shalt.err (!%p581_p10)
}
 0x2a8   :  { %s585_s27 = scalar_lea.hbm %s779_s6, 256 }
 0x2a9   :  { %p586_p11 = scmp.ne.s32.totalorder %s779_s6, %s585_s27  ;;  %p589_p12 = scmp.lt.u32.totalorder %s585_s27, %s779_s6 }
 0x2ab   :  { %p591_p13 = pnand %p589_p12, %p586_p11 }
 0x2ad   :  { %594 = shalt.err (!%p591_p13)
}
 0x2ae   :  { %362 = dma.vmem_to_hbm [thread:$0]  %s357_s21, 256, %s779_s6, [#allocation5], %s607_s9, %s607_s9, %s608_s10  }
 0x2af   :  { %603 = dma.done.wait [#allocation5], 256  }
 0x2b0   :  { %604 = vsyncadd [#allocation5], 4294967040 }
 0x2b1   :  { %366 = vsyncpa [#allocation4], 1 }
 0x2b2   :  { %367 = vsyncpa [#allocation7], 1 }
 0x2b3   :  { %368 = vsyncpa [#allocation10], 1 }
 0x2b4   :  { %369 = vsyncpa [#allocation13], 1 }
 0x2b5   :  { %370 = vsyncpa [#allocation5], 1 }

// kernel: siamese_forward.19
= control target key start
LH: loop header
LB: loop body
LE: loop exit
PB: predicated region body
PF: predicated region fallthrough
CT: control target
= control target key end

     0   :  { %10 = vsyncpa [#allocation3], 0  ;;  %s727_s0 = inlined_call_operand.hbm [shape: bf16[2,64], index: 0, kind: input, shape index: {}]   ;;  %s728_s1 = inlined_call_operand.hbm [shape: bf16[64,256], index: 1, kind: input, shape index: {}]   ;;  %s729_s2 = inlined_call_operand.hbm [shape: f32[1,256], index: 2, kind: input, shape index: {}]   ;;  %s730_s3 = inlined_call_operand.hbm [shape: bf16[256,128], index: 3, kind: input, shape index: {}]   ;;  %s731_s4 = inlined_call_operand.hbm [shape: f32[1,128], index: 4, kind: input, shape index: {}]   ;;  %s732_s5 = inlined_call_operand.hbm [shape: f32[2,128], index: 5, kind: output, shape index: {}]  }
   0x1   :  { %11 = vsyncpa [#allocation6], 0 }
   0x2   :  { %12 = vsyncpa [#allocation9], 0 }
   0x3   :  { %13 = vsyncpa [#allocation4], 0  ;;  %s614_s18 = smov [#allocation5]   ;;  %s474_s22 = scalar_lea.hbm %s728_s1, 1024 }
   0x4   :  { %s29_s19 = sshll.u32 %s614_s18, 4  ;;  %p475_p0 = scmp.ne.s32.totalorder %s728_s1, %s474_s22  ;;  %s30_s19 = int_to_ptr.vmem [resolvable:$true] %s29_s19 }
   0x5   :  { %p478_p1 = scmp.lt.u32.totalorder %s474_s22, %s728_s1 }
   0x7   :  { %p480_p2 = pnand %p478_p1, %p475_p0 }
   0x9   :  { %483 = shalt.err (!%p480_p2)
}
   0xa   :  { %s484_s27 = scalar_lea.vmem %s30_s19, 1024  ;;  %p489_p4 = scmp.lt.s32.totalorder %s30_s19, %s30_s19 }
   0xb   :  { %p485_p3 = scmp.ne.s32.totalorder %s30_s19, %s484_s27  ;;  %p490_p5 = scmp.lt.s32.totalorder %s484_s27, %s484_s27 }
   0xd   :  { %p491_p6 = por %p490_p5, %p489_p4 }
   0xf   :  { %p492_p7 = pnand %p491_p6, %p485_p3 }
  0x11   :  { %495 = shalt.err (!%p492_p7)
}
  0x12   :  { %s615_s28 = smov 128   ;;  %s616_s29 = smov 8  }
  0x13   :  { %35 = dma.hbm_to_vmem [thread:$0]  %s728_s1, 1024, %s30_s19, [#allocation6], %s615_s28, %s615_s28, %s616_s29  }
  0x14   :  { %s617_s7 = smov [#allocation8]   ;;  %s496_s11 = scalar_lea.hbm %s730_s3, 2048 }
  0x15   :  { %s51_s8 = sshll.u32 %s617_s7, 4  ;;  %p497_p8 = scmp.ne.s32.totalorder %s730_s3, %s496_s11  ;;  %s52_s8 = int_to_ptr.vmem [resolvable:$true] %s51_s8 }
  0x16   :  { %p500_p9 = scmp.lt.u32.totalorder %s496_s11, %s730_s3 }
  0x18   :  { %p502_p10 = pnand %p500_p9, %p497_p8 }
  0x1a   :  { %505 = shalt.err (!%p502_p10)
}
  0x1b   :  { %s506_s16 = scalar_lea.vmem %s52_s8, 2048  ;;  %p511_p12 = scmp.lt.s32.totalorder %s52_s8, %s52_s8 }
  0x1c   :  { %p507_p11 = scmp.ne.s32.totalorder %s52_s8, %s506_s16  ;;  %p512_p13 = scmp.lt.s32.totalorder %s506_s16, %s506_s16 }
  0x1e   :  { %p513_p0 = por %p512_p13, %p511_p12 }
  0x20   :  { %p514_p1 = pnand %p513_p0, %p507_p11 }
  0x22   :  { %517 = shalt.err (!%p514_p1)
}
  0x23   :  { %s618_s1 = smov 64   ;;  %s619_s17 = smov 4  }
  0x24   :  { %57 = dma.hbm_to_vmem [thread:$0]  %s730_s3, 2048, %s52_s8, [#allocation9], %s618_s1, %s618_s1, %s619_s17  }
  0x25   :  { %s620_s20 = smov [#allocation2]   ;;  %s621_s22 = smov [#allocation7]  }
  0x26   :  { %s20_s21 = sshll.u32 %s620_s20, 4  ;;  %s42_s23 = sshll.u32 %s621_s22, 4  ;;  %s21_s21 = int_to_ptr.vmem [resolvable:$true] %s20_s21  ;;  %s43_s23 = int_to_ptr.vmem [resolvable:$true] %s42_s23 }
  0x27   :  { %s518_s26 = scalar_lea.hbm %s727_s0, 16 }
  0x28   :  { %p519_p2 = scmp.ne.s32.totalorder %s727_s0, %s518_s26  ;;  %p522_p3 = scmp.lt.u32.totalorder %s518_s26, %s727_s0 }
  0x2a   :  { %p524_p4 = pnand %p522_p3, %p519_p2 }
  0x2c   :  { %527 = shalt.err (!%p524_p4)
}
  0x2d   :  { %s528_s3 = scalar_lea.vmem %s21_s21, 16  ;;  %s532_s6 = scalar_lea.vmem %s21_s21, 32 }
  0x2e   :  { %p529_p5 = scmp.ne.s32.totalorder %s21_s21, %s528_s3  ;;  %p533_p6 = scmp.lt.s32.totalorder %s21_s21, %s21_s21 }
  0x2f   :  { %p534_p7 = scmp.lt.s32.totalorder %s532_s6, %s528_s3 }
  0x31   :  { %p535_p8 = por %p534_p7, %p533_p6 }
  0x33   :  { %p536_p9 = pnand %p535_p8, %p529_p5 }
  0x35   :  { %539 = shalt.err (!%p536_p9)
}
  0x36   :  { %23 = dma.hbm_to_vmem [thread:$0]  %s727_s0, 16, %s21_s21, [#allocation3]  }
  0x37   :  { %s540_s11 = scalar_lea.hbm %s729_s2, 32 }
  0x38   :  { %p541_p10 = scmp.ne.s32.totalorder %s729_s2, %s540_s11  ;;  %p544_p11 = scmp.lt.u32.totalorder %s540_s11, %s729_s2 }
  0x3a   :  { %p546_p12 = pnand %p544_p11, %p541_p10 }
  0x3c   :  { %549 = shalt.err (!%p546_p12)
}
  0x3d   :  { %s550_s16 = scalar_lea.vmem %s43_s23, 32  ;;  %p555_p0 = scmp.lt.s32.totalorder %s43_s23, %s43_s23 }
  0x3e   :  { %p551_p13 = scmp.ne.s32.totalorder %s43_s23, %s550_s16  ;;  %p556_p1 = scmp.lt.s32.totalorder %s550_s16, %s550_s16 }
  0x40   :  { %p557_p2 = por %p556_p1, %p555_p0 }
  0x42   :  { %p558_p3 = pnand %p557_p2, %p551_p13 }
  0x44   :  { %561 = shalt.err (!%p558_p3)
}
  0x45   :  { %45 = dma.hbm_to_vmem [thread:$0]  %s729_s2, 32, %s43_s23, [#allocation6]  }
  0x46   :  { %s622_s17 = smov [#allocation10]   ;;  %s562_s21 = scalar_lea.hbm %s731_s4, 16 }
  0x47   :  { %s64_s18 = sshll.u32 %s622_s17, 4  ;;  %p563_p4 = scmp.ne.s32.totalorder %s731_s4, %s562_s21  ;;  %s65_s18 = int_to_ptr.vmem [resolvable:$true] %s64_s18 }
  0x48   :  { %p566_p5 = scmp.lt.u32.totalorder %s562_s21, %s731_s4 }
  0x4a   :  { %p568_p6 = pnand %p566_p5, %p563_p4 }
  0x4c   :  { %571 = shalt.err (!%p568_p6)
}
  0x4d   :  { %s572_s27 = scalar_lea.vmem %s65_s18, 16  ;;  %s576_s2 = scalar_lea.vmem %s65_s18, 32 }
  0x4e   :  { %p573_p7 = scmp.ne.s32.totalorder %s65_s18, %s572_s27  ;;  %p577_p8 = scmp.lt.s32.totalorder %s65_s18, %s65_s18 }
  0x4f   :  { %p578_p9 = scmp.lt.s32.totalorder %s576_s2, %s572_s27 }
  0x51   :  { %p579_p10 = por %p578_p9, %p577_p8 }
  0x53   :  { %p580_p11 = pnand %p579_p10, %p573_p7 }
  0x55   :  { %583 = shalt.err (!%p580_p11)
}
  0x56   :  { %67 = dma.hbm_to_vmem [thread:$0]  %s731_s4, 16, %s65_s18, [#allocation9]  }
  0x57   :  { %606 = dma.done.wait [#allocation3], 16  }
  0x58   :  { %607 = vsyncadd [#allocation3], 4294967280 }
  0x59   :  { %608 = dma.done.wait [#allocation6], 1056  }
  0x5a   :  { %609 = vsyncadd [#allocation6], 4294966240 }
  0x5b   :  { %610 = dma.done.wait [#allocation9], 2064  }
  0x5c   :  { %611 = vsyncadd [#allocation9], 4294965232  ;;  %v623_v0 = vmov 0   ;;  %v446_v1 = vld [vmem:[#allocation5 + $0x4] ss:$8 sps:$4 sm:$0xff]   ;;  %v462_v12 = vld [vmem:[#allocation8 + $0x50] sm:$0xff]   ;;  %v95_v26 = vlaneseq }
  0x5d   :  { %181 = vmatprep.mubr.bf16.mxu0 %v623_v0  ;;  %v448_v2 = vld [vmem:[#allocation5] ss:$8 sps:$4 sm:$0xff]   ;;  %149 = vmatprep.subr.bf16.mxu0 %v446_v1  ;;  %v449_v3 = vld [vmem:[#allocation5 + $0x14] ss:$8 sps:$4 sm:$0xff]   ;;  %v451_v4 = vld [vmem:[#allocation5 + $0x10] ss:$8 sps:$4 sm:$0xff]  }
  0x5e   :  { %150 = vmatpush1.bf16.msra.mxu0 %v448_v2  ;;  %v452_v5 = vld [vmem:[#allocation5 + $0x24] ss:$8 sps:$4 sm:$0xff]   ;;  %v454_v6 = vld [vmem:[#allocation5 + $0x20] ss:$8 sps:$4 sm:$0xff]   ;;  %v455_v7 = vld [vmem:[#allocation5 + $0x34] ss:$8 sps:$4 sm:$0xff]  }
  0x5f   :  { %151 = vmatprep.subr.bf16.mxu0 %v449_v3  ;;  %v458_v8 = vld [vmem:[#allocation8 + $0x40] sm:$0xff]   ;;  %v460_v10 = vld [vmem:[#allocation8 + $0x48] sm:$0xff]   ;;  %v463_v14 = vld [vmem:[#allocation8 + $0x10] sm:$0xff]   ;;  %vm145_vm0 = vcmask 523264   ;;  %v96_v27 = vshrl.u32 %v95_v26, 7  ;;  %s624_s4 = smov [#allocation11]  }
  0x60   :  { %v459_v9 = vld [vmem:[#allocation8] sm:$0xff]   ;;  %413 = vmatprep.subr.bf16.mxu1 %v458_v8  ;;  %v461_v11 = vld [vmem:[#allocation8 + $0x8] sm:$0xff]   ;;  %v464_v15 = vld [vmem:[#allocation8 + $0x58] sm:$0xff]   ;;  %s376_s29 = sshll.u32 %s624_s4, 4  ;;  %s377_s29 = int_to_ptr.vmem [resolvable:$true] %s376_s29 }
  0x61   :  { %414 = vmatpush3.bf16.msra.mxu1 %v459_v9  ;;  %v457_v13 = vld [vmem:[#allocation5 + $0x30] ss:$8 sps:$4 sm:$0xff]   ;;  %v84_v16 = vld [vmem:[#allocation2] sm:$0x1]  ;;  %v466_v18 = vld [vmem:[#allocation8 + $0x60] sm:$0xff]   ;;  %v97_v28 = vsub.s32 0, %v96_v27  ;;  %p589_p13 = scmp.lt.s32.totalorder %s377_s29, %s377_s29 }
  0x62   :  { %152 = vmatpush1.bf16.msra.mxu0 %v451_v4  ;;  %415 = vmatprep.subr.bf16.mxu1 %v460_v10  ;;  %v465_v17 = vld [vmem:[#allocation8 + $0x18] sm:$0xff]   ;;  %v467_v19 = vld [vmem:[#allocation8 + $0x20] sm:$0xff]   ;;  %v468_v20 = vld [vmem:[#allocation8 + $0x68] sm:$0xff]   ;;  %v101_v30 = vsub.s32 1, %v96_v27  ;;  %s584_s30 = scalar_lea.vmem %s377_s29, 32 }
  0x63   :  { %153 = vmatprep.subr.bf16.mxu0 %v452_v5  ;;  %v469_v21 = vld [vmem:[#allocation8 + $0x28] sm:$0xff]   ;;  %v470_v22 = vld [vmem:[#allocation8 + $0x70] sm:$0xff]   ;;  %v472_v24 = vld [vmem:[#allocation8 + $0x78] sm:$0xff]   ;;  %p585_p12 = scmp.ne.s32.totalorder %s377_s29, %s584_s30  ;;  %p590_p0 = scmp.lt.s32.totalorder %s584_s30, %s584_s30 }
  0x64   :  { %v471_v23 = vld [vmem:[#allocation8 + $0x30] sm:$0xff]   ;;  %v473_v25 = vld [vmem:[#allocation8 + $0x38] sm:$0xff]   ;;  %v396_v44 = vld [vmem:[#allocation10] ss:$0 sm:$0xff] }
  0x65   :  { %416 = vmatpush3.bf16.msra.mxu1 %v461_v11  ;;  %v93_v29 = vld [vmem:[#allocation7] sm:$0x3]  ;;  %p591_p1 = por %p590_p0, %p589_p13 }
  0x66   :  { %154 = vmatpush1.bf16.msra.mxu0 %v454_v6  ;;  %417 = vmatprep.subr.bf16.mxu1 %v462_v12  ;;  %v98_v31 = vrot.slane %v93_v29, %v97_v28  ;;  %v102_v32 = vrot.slane %v93_v29, %v101_v30 }
  0x67   :  { %155 = vmatprep.subr.bf16.mxu0 %v455_v7  ;;  %p592_p2 = pnand %p591_p1, %p585_p12 }
  0x69   :  { %418 = vmatpush3.bf16.msra.mxu1 %v463_v14 }
  0x6a   :  { %156 = vmatpush1.bf16.msra.mxu0 %v457_v13  ;;  %419 = vmatprep.subr.bf16.mxu1 %v464_v15 }
  0x6d   :  { %395 = vmatmul.mubr.msk.bf16.vlgmr.msra.gmra.mrb[0].mxu0 %vm145_vm0, %v84_v16  ;;  %420 = vmatpush3.bf16.msra.mxu1 %v465_v17 }
  0x6e   :  { %421 = vmatprep.subr.bf16.mxu1 %v466_v18 }
  0x71   :  { %422 = vmatpush3.bf16.msra.mxu1 %v467_v19 }
  0x72   :  { %423 = vmatprep.subr.bf16.mxu1 %v468_v20 }
  0x75   :  { %424 = vmatpush3.bf16.msra.mxu1 %v469_v21 }
  0x76   :  { %425 = vmatprep.subr.bf16.mxu1 %v470_v22 }
  0x79   :  { %426 = vmatpush3.bf16.msra.mxu1 %v471_v23 }
  0x7a   :  { %427 = vmatprep.subr.bf16.mxu1 %v472_v24 }
  0x7d   :  { %428 = vmatpush3.bf16.msra.mxu1 %v473_v25 }
 0x140   :  { %v183_v33 = vpop.f32.mrb[0].mxu0 }
 0x141   :  { %v184_v34 = vadd.f32 %v183_v33, %v98_v31  ;;  %v185_v35 = vpop.f32.mrb[1].mxu0 }
 0x142   :  { %v186_v36 = vadd.f32 %v185_v35, %v102_v32  ;;  %v187_v37 = vpop.f32.mrb[2].mxu0 }
 0x143   :  { %v190_v38 = vmax.f32 %v184_v34, 0.0  ;;  %v188_v39 = vpop.f32.mrb[3].mxu0 }
 0x144   :  { %v191_v40 = vmax.f32 %v186_v36, 0.0 }
 0x145   :  { %v192_v42 = vpack.c.bf16 %v190_v38, %v190_v38 }
 0x146   :  { %v193_v41 = vpack.c.bf16 %v191_v40, %v191_v40 }
 0x148   :  { %361 = vmatprep.mubr.bf16.mxu1 %v193_v41 }
 0x149   :  { %362 = vmatmul.mubr.bf16.vlgmr.msra.gmra.mrb[0].mxu1 %v192_v42 }
 0x21c   :  { %v429_v43 = vpop.f32.mrb[0].mxu1 }
 0x21d   :  { %v430_v45 = vpop.f32.mrb[1].mxu1 }
 0x21e   :  { %v431_v46 = vadd.f32 %v430_v45, %v429_v43  ;;  %v432_v47 = vpop.f32.mrb[2].mxu1 }
 0x21f   :  { %v433_v48 = vpop.f32.mrb[3].mxu1 }
 0x220   :  { %v364_v49 = vadd.f32 %v431_v46, %v396_v44 }
 0x222   :  { %369 = vst [vmem:[#allocation11] sm:$0x3] %v364_v49 }
 0x223   :  { %595 = shalt.err (!%p592_p2)
}
 0x224   :  { %s596_s7 = scalar_lea.hbm %s732_s5, 32 }
 0x225   :  { %p597_p3 = scmp.ne.s32.totalorder %s732_s5, %s596_s7  ;;  %p600_p4 = scmp.lt.u32.totalorder %s596_s7, %s732_s5 }
 0x227   :  { %p602_p5 = pnand %p600_p4, %p597_p3 }
 0x229   :  { %605 = shalt.err (!%p602_p5)
}
 0x22a   :  { %379 = dma.vmem_to_hbm [thread:$0]  %s377_s29, 32, %s732_s5, [#allocation4]  }
 0x22b   :  { %612 = dma.done.wait [#allocation4], 32  }
 0x22c   :  { %613 = vsyncadd [#allocation4], 4294967264 }
 0x22d   :  { %383 = vsyncpa [#allocation3], 1 }
 0x22e   :  { %384 = vsyncpa [#allocation6], 1 }
 0x22f   :  { %385 = vsyncpa [#allocation9], 1 }
 0x230   :  { %386 = vsyncpa [#allocation4], 1 }

</bundles_post_ra>
